<compile_context>
chip_gen: v6e
topology: v6e:2x2x1
jax: 0.10.0
libtpu: 0.0.40
codegen_flags: <defaults>
</compile_context>

<pallas_src>
from functools import partial
import math

import jax
import jax.numpy as jnp
from jax.experimental import pallas as pl
from jax.experimental.pallas import tpu as pltpu

_MIB = 1024 * 1024


# ------------------------------ Pallas kernel ------------------------------ #

def _full_attn_kernel(q_ref, k_ref, v_ref, o_ref, *maybe_a_ref, pack, bf16_exp):
    a_ref = maybe_a_ref[0] if maybe_a_ref else None

    q = q_ref[...]                        # (GB, TL, E)  MXU dtype, scale pre-folded
    k = k_ref[...]                        # (GB, S,  E)
    v = v_ref[...]                        # (GB, S,  D)

    # scores = (scale*q) @ k^T, batched over the group axis, f32 MXU accumulation.
    scores = jnp.einsum('gle,gse->gls', q, k,
                        preferred_element_type=jnp.float32)    # (GB, TL, S)

    # Numerically stable softmax over S.
    m = jnp.max(scores, axis=-1, keepdims=True)
    x = scores - m
    if bf16_exp:
        # v6e/v7x: bf16 EUP roughly doubles exp throughput; sum stays f32.
        p = jnp.exp(x.astype(jnp.bfloat16))
        denom = jnp.sum(p.astype(jnp.float32), axis=-1, keepdims=True)
        p_mm = p
    else:
        p = jnp.exp(x)
        denom = jnp.sum(p, axis=-1, keepdims=True)
        p_mm = p.astype(v.dtype)
    inv = pl.reciprocal(denom, approx=True)                     # EUP slot, f32

    if a_ref is not None:
        a_ref[...] = (p.astype(jnp.float32) * inv).astype(a_ref.dtype)

    # Deferred normalization: (exp @ v) * 1/sum.
    o = jnp.einsum('gls,gsd->gld', p_mm, v,
                   preferred_element_type=jnp.float32)          # (GB, TL, D) f32
    o = o * inv

    if pack > 1:
        gb, tl, d = o.shape
        o4 = o.reshape(gb // pack, pack, tl, d)   # split leading (batch) dim only
        for j in range(pack):                     # pack heads along the lane axis
            o_ref[:, :, j * d:(j + 1) * d] = o4[:, j].astype(o_ref.dtype)
    else:
        o_ref[...] = o.astype(o_ref.dtype)


# ------------------------------ sizing helpers ------------------------------ #

def _vmem_budget_and_limit():
    cap = None
    try:
        cap = int(pltpu.get_tpu_info().vmem_capacity_bytes)
    except Exception:
        cap = None
    if not cap:
        cap = 64 * _MIB                  # conservative default (v7x-sized VMEM)
    if cap >= 128 * _MIB:                # v5e / v6e: 128 MiB physical VMEM
        return 64 * _MIB, 96 * _MIB
    # v7x: 64 MiB per TensorCore -> stay well clear of the physical limit.
    return 32 * _MIB, 48 * _MIB


def _bf16_eup_supported():
    try:
        kind = jax.devices()[0].device_kind.lower()
    except Exception:
        return False
    return not any(v in kind for v in ("v2", "v3", "v4", "v5"))


def _choose_l_tile(L, max_rows=1024):
    """Full L when reasonably small (keeps the MXU fed), else the largest
    16-multiple divisor of L (bf16 sublane packing)."""
    if L <= max_rows:
        return L
    for tl in (1024, 512, 256, 128, 64, 32, 16):
        if L % tl == 0:
            return tl
    return L


def _per_group_bytes(tl, s, e, d, in_bytes, out_bytes, bf16_exp, want_attn):
    total = 2 * in_bytes * (tl * e + s * e + s * d)   # double-buffered input blocks
    total += 2 * out_bytes * tl * d                    # double-buffered output block
    total += 4 * tl * s                                # f32 scores
    total += (2 if bf16_exp else 6) * tl * s           # exp (+ bf16 copy on f32 path)
    total += 8 * tl * d                                # f32 PV result + store staging
    if want_attn:
        total += 2 * 4 * tl * s + 4 * tl * s           # A output block + f32 probs
    return total


# ------------------------------ host wrapper ------------------------------- #

def full_attention_ds(queries, keys, values, *, scale=None, output_attention=False,
                      mxu_dtype=jnp.bfloat16, vmem_limit_bytes=None):
    B, N, L, H, E = queries.shape
    S = keys.shape[2]
    D = values.shape[4]
    assert keys.shape == (B, N, S, H, E), keys.shape
    assert values.shape == (B, N, S, H, D), values.shape

    scale = float(scale) if scale is not None else 1.0 / math.sqrt(E)
    out_dtype = queries.dtype
    in_bytes = jnp.dtype(mxu_dtype).itemsize
    out_bytes = jnp.dtype(out_dtype).itemsize

    budget, limit = _vmem_budget_and_limit()
    if vmem_limit_bytes is not None:
        limit = int(vmem_limit_bytes)
        budget = min(budget, max(limit - 16 * _MIB, limit // 2))
    bf16_exp = (jnp.dtype(mxu_dtype) == jnp.dtype(jnp.bfloat16)) and _bf16_eup_supported()

    # Fold (B, N, H) -> G with feature dim last (lane axis); fold the softmax
    # scale and the MXU-dtype cast into this already-materializing copy.
    G = B * N * H
    qf = (jnp.transpose(queries, (0, 1, 3, 2, 4)) * scale).reshape(G, L, E).astype(mxu_dtype)
    kf = jnp.transpose(keys, (0, 1, 3, 2, 4)).reshape(G, S, E).astype(mxu_dtype)
    vf = jnp.transpose(values, (0, 1, 3, 2, 4)).reshape(G, S, D).astype(mxu_dtype)

    # Lane-dense output packing: pack heads so the output block last dim is 128.
    pack = 128 // D if (D < 128 and 128 % D == 0) else 1
    if pack > G:
        pack = 1
    G_pad = int(pl.cdiv(G, pack)) * pack
    if G_pad != G:
        padg = G_pad - G
        qf = jnp.pad(qf, ((0, padg), (0, 0), (0, 0)))
        kf = jnp.pad(kf, ((0, padg), (0, 0), (0, 0)))
        vf = jnp.pad(vf, ((0, padg), (0, 0), (0, 0)))
    GP = G_pad // pack

    # Tile sizes.
    TL = _choose_l_tile(L)
    while (pack * _per_group_bytes(TL, S, E, D, in_bytes, out_bytes, bf16_exp,
                                   output_attention) > budget
           and TL % 32 == 0 and TL > 32):
        TL //= 2                                      # stays a multiple of 16
    per_gp = pack * _per_group_bytes(TL, S, E, D, in_bytes, out_bytes, bf16_exp,
                                     output_attention)
    # TODO(synk): if one packed group still exceeds the budget (very long S), a
    # flash-style online softmax over an "arbitrary" S grid axis is needed.
    GBP = max(1, min(GP, budget // per_gp))
    for dvs in range(GBP, 0, -1):                     # prefer a divisor of GP if close
        if GP % dvs == 0:
            if 4 * dvs >= 3 * GBP:
                GBP = dvs
            break
    GB = GBP * pack

    grid = (int(pl.cdiv(GP, GBP)), int(pl.cdiv(L, TL)))

    in_specs = [
        pl.BlockSpec((GB, TL, E), lambda g, l: (g, l, 0)),
        pl.BlockSpec((GB, S, E), lambda g, l: (g, 0, 0)),    # K reused across L tiles
        pl.BlockSpec((GB, S, D), lambda g, l: (g, 0, 0)),    # V reused across L tiles
    ]
    out_specs = [pl.BlockSpec((GBP, TL, pack * D), lambda g, l: (g, l, 0))]
    out_shape = [jax.ShapeDtypeStruct((GP, L, pack * D), out_dtype)]
    if output_attention:
        out_specs.append(pl.BlockSpec((GB, TL, S), lambda g, l: (g, l, 0)))
        out_shape.append(jax.ShapeDtypeStruct((G_pad, L, S), jnp.float32))

    kern = partial(_full_attn_kernel, pack=pack, bf16_exp=bf16_exp)
    outs = pl.pallas_call(
        kern,
        grid=grid,
        in_specs=in_specs,
        out_specs=out_specs,
        out_shape=out_shape,
        compiler_params=pltpu.CompilerParams(
            # G is the outer "parallel" axis -> megacore (v7x) shards groups and
            # keeps K/V reuse across the inner (sequential) L axis on each core.
            dimension_semantics=("parallel", "arbitrary"),
            vmem_limit_bytes=limit,
        ),
    )(qf, kf, vf)

    # Unpack the lane-packed output back to (B, N, L, H, D).
    o_packed = outs[0]                                 # (GP, L, pack*D)
    if pack > 1:
        o_flat = (o_packed.reshape(GP, L, pack, D)
                  .transpose(0, 2, 1, 3)
                  .reshape(G_pad, L, D))
    else:
        o_flat = o_packed
    out = o_flat[:G].reshape(B, N, H, L, D).transpose(0, 1, 3, 2, 4)

    if output_attention:
        A = outs[1][:G].reshape(B, N, H, L, S)         # (B, N, H, L, S)
        return out, A
    return out, None


class FullAttentionDSPallas:
    """Pallas TPU counterpart of FullAttention_DS (inference forward)."""

    def __init__(self, mask_flag=True, factor=5, scale=None,
                 attention_dropout=0.1, output_attention=False,
                 mxu_dtype=jnp.bfloat16):
        self.scale = scale
        self.mask_flag = mask_flag          # unused by the reference forward
        self.factor = factor                # unused by the reference forward
        self.output_attention = output_attention
        self.attention_dropout = attention_dropout
        self.mxu_dtype = mxu_dtype
        # TODO(synk): attention dropout is a no-op here (inference); training-mode
        # dropout would need pltpu.prng_seed/prng_random_bits masks in the kernel.

    def __call__(self, queries, keys, values, attn_mask=None, tau=None, delta=None):
        # attn_mask / tau / delta are ignored, exactly like the reference forward.
        return full_attention_ds(queries, keys, values,
                                 scale=self.scale,
                                 output_attention=self.output_attention,
                                 mxu_dtype=self.mxu_dtype)


if __name__ == "__main__":
    B, N, L, S, H, E, D = 2, 4, 8, 8, 4, 8, 8
    key = jax.random.PRNGKey(0)
    kq, kk, kv = jax.random.split(key, 3)
    queries = jax.random.normal(kq, (B, N, L, H, E), jnp.float32)
    keys = jax.random.normal(kk, (B, N, S, H, E), jnp.float32)
    values = jax.random.normal(kv, (B, N, S, H, D), jnp.float32)

    # pure-JAX reference (dropout = identity at inference)
    ref_scale = 1.0 / math.sqrt(E)
    scores = jnp.einsum('bnlhe,bnshe->bnhls', queries, keys)
    probs = jax.nn.softmax(ref_scale * scores, axis=-1)
    ref = jnp.einsum('bnhls,bnshd->bnlhd', probs, values)

    attn = FullAttentionDSPallas(mask_flag=True, factor=5, scale=None,
                                 attention_dropout=0.1, output_attention=False)
    run = jax.jit(lambda q, k, v: attn(q, k, v, None, None, None))
    out, A = run(queries, keys, values)
    out = jax.block_until_ready(out)

    assert out.shape == (B, N, L, H, D), out.shape
    assert A is None
    assert bool(jnp.all(jnp.isfinite(out)))
    err = float(jnp.max(jnp.abs(out - ref)))
    assert err < 5e-2, f"max abs err vs reference: {err}"

    # also exercise the output_attention path
    attn_a = FullAttentionDSPallas(output_attention=True)
    out2, A2 = attn_a(queries, keys, values, None, None, None)
    out2, A2 = jax.block_until_ready((out2, A2))
    assert out2.shape == (B, N, L, H, D), out2.shape
    assert A2.shape == (B, N, H, L, S), A2.shape
    err2 = float(jnp.max(jnp.abs(out2 - ref)))
    errA = float(jnp.max(jnp.abs(A2 - probs)))
    assert err2 < 5e-2 and errA < 5e-2, (err2, errA)
    print("KERNEL_OK")
</pallas_src>

<mosaic_0001>
module attributes {stable_mosaic.version = 11 : i64} {
  func.func @_full_attn_kernel(%arg0: i32, %arg1: i32, %arg2: memref<32x8x8xbf16, #tpu.memory_space<vmem>>, %arg3: memref<32x8x8xbf16, #tpu.memory_space<vmem>>, %arg4: memref<32x8x8xbf16, #tpu.memory_space<vmem>>, %arg5: memref<2x8x128xf32, #tpu.memory_space<vmem>>) attributes {dimension_semantics = [#tpu.dimension_semantics<parallel>, #tpu.dimension_semantics<arbitrary>], iteration_bounds = array<i64: 1, 1>, scalar_prefetch = 0 : i64, scratch_operands = 0 : i64, tpu.core_type = #tpu.core_type<tc>, window_params = [{transform_indices = @transform_0, window_bounds = array<i64: 32, 8, 8>}, {transform_indices = @transform_1, window_bounds = array<i64: 32, 8, 8>}, {transform_indices = @transform_2, window_bounds = array<i64: 32, 8, 8>}, {transform_indices = @transform_3, window_bounds = array<i64: 2, 8, 128>}]} {
    %c0 = arith.constant 0 : index
    %c0_0 = arith.constant 0 : index
    %c0_1 = arith.constant 0 : index
    %0 = vector.load %arg2[%c0, %c0_0, %c0_1] : memref<32x8x8xbf16, #tpu.memory_space<vmem>>, vector<32x8x8xbf16>
    %c0_2 = arith.constant 0 : index
    %c0_3 = arith.constant 0 : index
    %c0_4 = arith.constant 0 : index
    %1 = vector.load %arg3[%c0_2, %c0_3, %c0_4] : memref<32x8x8xbf16, #tpu.memory_space<vmem>>, vector<32x8x8xbf16>
    %c0_5 = arith.constant 0 : index
    %c0_6 = arith.constant 0 : index
    %c0_7 = arith.constant 0 : index
    %2 = vector.load %arg4[%c0_5, %c0_6, %c0_7] : memref<32x8x8xbf16, #tpu.memory_space<vmem>>, vector<32x8x8xbf16>
    "tpu.trace_start"() <{level = 10 : i32, message = "gle,gse->gls"}> : () -> ()
    %cst = arith.constant dense<0.000000e+00> : vector<32x8x8xf32>
    %3 = tpu.matmul %0, %1, %cst {dimension_numbers = #tpu.dot_dimension_numbers<[2], [2], [1], [1], [0, 0, 0, 1, 1, 1], [0], [0]>} : vector<32x8x8xbf16>, vector<32x8x8xbf16>, vector<32x8x8xf32> -> vector<32x8x8xf32>
    "tpu.trace_stop"() : () -> ()
    %cst_8 = arith.constant dense<0xFF800000> : vector<32x8xf32>
    %4 = vector.multi_reduction <maximumf>, %3, %cst_8 [2] : vector<32x8x8xf32> to vector<32x8xf32>
    %5 = vector.shape_cast %4 : vector<32x8xf32> to vector<32x8x1xf32>
    %6 = vector.broadcast %5 : vector<32x8x1xf32> to vector<32x8x8xf32>
    %7 = arith.subf %3, %6 : vector<32x8x8xf32>
    %8 = arith.truncf %7 : vector<32x8x8xf32> to vector<32x8x8xbf16>
    %9 = math.exp %8 : vector<32x8x8xbf16>
    %10 = arith.extf %9 : vector<32x8x8xbf16> to vector<32x8x8xf32>
    %cst_9 = arith.constant dense<0.000000e+00> : vector<32x8xf32>
    %11 = vector.multi_reduction <add>, %10, %cst_9 [2] : vector<32x8x8xf32> to vector<32x8xf32>
    %12 = vector.shape_cast %11 : vector<32x8xf32> to vector<32x8x1xf32>
    %13 = tpu.reciprocal %12 {approx = true} : vector<32x8x1xf32> -> vector<32x8x1xf32>
    "tpu.trace_start"() <{level = 10 : i32, message = "gls,gsd->gld"}> : () -> ()
    %cst_10 = arith.constant dense<0.000000e+00> : vector<32x8x8xf32>
    %14 = tpu.matmul %9, %2, %cst_10 {dimension_numbers = #tpu.dot_dimension_numbers<[2], [1], [1], [2], [0, 0, 0, 1, 1, 2], [0], [0]>} : vector<32x8x8xbf16>, vector<32x8x8xbf16>, vector<32x8x8xf32> -> vector<32x8x8xf32>
    "tpu.trace_stop"() : () -> ()
    %15 = vector.broadcast %13 : vector<32x8x1xf32> to vector<32x8x8xf32>
    %16 = arith.mulf %14, %15 : vector<32x8x8xf32>
    %17 = vector.shape_cast %16 : vector<32x8x8xf32> to vector<2x16x8x8xf32>
    %18 = vector.extract_strided_slice %17 {offsets = [0, 0, 0, 0], sizes = [2, 1, 8, 8], strides = [1, 1, 1, 1]} : vector<2x16x8x8xf32> to vector<2x1x8x8xf32>
    %19 = vector.shape_cast %18 : vector<2x1x8x8xf32> to vector<2x8x8xf32>
    %c0_11 = arith.constant 0 : index
    %c0_12 = arith.constant 0 : index
    %c0_13 = arith.constant 0 : index
    %20 = vector.load %arg5[%c0_11, %c0_12, %c0_13] : memref<2x8x128xf32, #tpu.memory_space<vmem>>, vector<2x8x8xf32>
    tpu.vector_store %arg5[%c0_11, %c0_12, %c0_13], %19 {strides = array<i32>} : memref<2x8x128xf32, #tpu.memory_space<vmem>>, vector<2x8x8xf32>,
    %21 = vector.extract_strided_slice %17 {offsets = [0, 1, 0, 0], sizes = [2, 1, 8, 8], strides = [1, 1, 1, 1]} : vector<2x16x8x8xf32> to vector<2x1x8x8xf32>
    %22 = vector.shape_cast %21 : vector<2x1x8x8xf32> to vector<2x8x8xf32>
    %c0_14 = arith.constant 0 : index
    %c0_15 = arith.constant 0 : index
    %c8 = arith.constant 8 : index
    %23 = vector.load %arg5[%c0_14, %c0_15, %c8] : memref<2x8x128xf32, #tpu.memory_space<vmem>>, vector<2x8x8xf32>
    tpu.vector_store %arg5[%c0_14, %c0_15, %c8], %22 {strides = array<i32>} : memref<2x8x128xf32, #tpu.memory_space<vmem>>, vector<2x8x8xf32>,
    %24 = vector.extract_strided_slice %17 {offsets = [0, 2, 0, 0], sizes = [2, 1, 8, 8], strides = [1, 1, 1, 1]} : vector<2x16x8x8xf32> to vector<2x1x8x8xf32>
    %25 = vector.shape_cast %24 : vector<2x1x8x8xf32> to vector<2x8x8xf32>
    %c0_16 = arith.constant 0 : index
    %c0_17 = arith.constant 0 : index
    %c16 = arith.constant 16 : index
    %26 = vector.load %arg5[%c0_16, %c0_17, %c16] : memref<2x8x128xf32, #tpu.memory_space<vmem>>, vector<2x8x8xf32>
    tpu.vector_store %arg5[%c0_16, %c0_17, %c16], %25 {strides = array<i32>} : memref<2x8x128xf32, #tpu.memory_space<vmem>>, vector<2x8x8xf32>,
    %27 = vector.extract_strided_slice %17 {offsets = [0, 3, 0, 0], sizes = [2, 1, 8, 8], strides = [1, 1, 1, 1]} : vector<2x16x8x8xf32> to vector<2x1x8x8xf32>
    %28 = vector.shape_cast %27 : vector<2x1x8x8xf32> to vector<2x8x8xf32>
    %c0_18 = arith.constant 0 : index
    %c0_19 = arith.constant 0 : index
    %c24 = arith.constant 24 : index
    %29 = vector.load %arg5[%c0_18, %c0_19, %c24] : memref<2x8x128xf32, #tpu.memory_space<vmem>>, vector<2x8x8xf32>
    tpu.vector_store %arg5[%c0_18, %c0_19, %c24], %28 {strides = array<i32>} : memref<2x8x128xf32, #tpu.memory_space<vmem>>, vector<2x8x8xf32>,
    %30 = vector.extract_strided_slice %17 {offsets = [0, 4, 0, 0], sizes = [2, 1, 8, 8], strides = [1, 1, 1, 1]} : vector<2x16x8x8xf32> to vector<2x1x8x8xf32>
    %31 = vector.shape_cast %30 : vector<2x1x8x8xf32> to vector<2x8x8xf32>
    %c0_20 = arith.constant 0 : index
    %c0_21 = arith.constant 0 : index
    %c32 = arith.constant 32 : index
    %32 = vector.load %arg5[%c0_20, %c0_21, %c32] : memref<2x8x128xf32, #tpu.memory_space<vmem>>, vector<2x8x8xf32>
    tpu.vector_store %arg5[%c0_20, %c0_21, %c32], %31 {strides = array<i32>} : memref<2x8x128xf32, #tpu.memory_space<vmem>>, vector<2x8x8xf32>,
    %33 = vector.extract_strided_slice %17 {offsets = [0, 5, 0, 0], sizes = [2, 1, 8, 8], strides = [1, 1, 1, 1]} : vector<2x16x8x8xf32> to vector<2x1x8x8xf32>
    %34 = vector.shape_cast %33 : vector<2x1x8x8xf32> to vector<2x8x8xf32>
    %c0_22 = arith.constant 0 : index
    %c0_23 = arith.constant 0 : index
    %c40 = arith.constant 40 : index
    %35 = vector.load %arg5[%c0_22, %c0_23, %c40] : memref<2x8x128xf32, #tpu.memory_space<vmem>>, vector<2x8x8xf32>
    tpu.vector_store %arg5[%c0_22, %c0_23, %c40], %34 {strides = array<i32>} : memref<2x8x128xf32, #tpu.memory_space<vmem>>, vector<2x8x8xf32>,
    %36 = vector.extract_strided_slice %17 {offsets = [0, 6, 0, 0], sizes = [2, 1, 8, 8], strides = [1, 1, 1, 1]} : vector<2x16x8x8xf32> to vector<2x1x8x8xf32>
    %37 = vector.shape_cast %36 : vector<2x1x8x8xf32> to vector<2x8x8xf32>
    %c0_24 = arith.constant 0 : index
    %c0_25 = arith.constant 0 : index
    %c48 = arith.constant 48 : index
    %38 = vector.load %arg5[%c0_24, %c0_25, %c48] : memref<2x8x128xf32, #tpu.memory_space<vmem>>, vector<2x8x8xf32>
    tpu.vector_store %arg5[%c0_24, %c0_25, %c48], %37 {strides = array<i32>} : memref<2x8x128xf32, #tpu.memory_space<vmem>>, vector<2x8x8xf32>,
    %39 = vector.extract_strided_slice %17 {offsets = [0, 7, 0, 0], sizes = [2, 1, 8, 8], strides = [1, 1, 1, 1]} : vector<2x16x8x8xf32> to vector<2x1x8x8xf32>
    %40 = vector.shape_cast %39 : vector<2x1x8x8xf32> to vector<2x8x8xf32>
    %c0_26 = arith.constant 0 : index
    %c0_27 = arith.constant 0 : index
    %c56 = arith.constant 56 : index
    %41 = vector.load %arg5[%c0_26, %c0_27, %c56] : memref<2x8x128xf32, #tpu.memory_space<vmem>>, vector<2x8x8xf32>
    tpu.vector_store %arg5[%c0_26, %c0_27, %c56], %40 {strides = array<i32>} : memref<2x8x128xf32, #tpu.memory_space<vmem>>, vector<2x8x8xf32>,
    %42 = vector.extract_strided_slice %17 {offsets = [0, 8, 0, 0], sizes = [2, 1, 8, 8], strides = [1, 1, 1, 1]} : vector<2x16x8x8xf32> to vector<2x1x8x8xf32>
    %43 = vector.shape_cast %42 : vector<2x1x8x8xf32> to vector<2x8x8xf32>
    %c0_28 = arith.constant 0 : index
    %c0_29 = arith.constant 0 : index
    %c64 = arith.constant 64 : index
    %44 = vector.load %arg5[%c0_28, %c0_29, %c64] : memref<2x8x128xf32, #tpu.memory_space<vmem>>, vector<2x8x8xf32>
    tpu.vector_store %arg5[%c0_28, %c0_29, %c64], %43 {strides = array<i32>} : memref<2x8x128xf32, #tpu.memory_space<vmem>>, vector<2x8x8xf32>,
    %45 = vector.extract_strided_slice %17 {offsets = [0, 9, 0, 0], sizes = [2, 1, 8, 8], strides = [1, 1, 1, 1]} : vector<2x16x8x8xf32> to vector<2x1x8x8xf32>
    %46 = vector.shape_cast %45 : vector<2x1x8x8xf32> to vector<2x8x8xf32>
    %c0_30 = arith.constant 0 : index
    %c0_31 = arith.constant 0 : index
    %c72 = arith.constant 72 : index
    %47 = vector.load %arg5[%c0_30, %c0_31, %c72] : memref<2x8x128xf32, #tpu.memory_space<vmem>>, vector<2x8x8xf32>
    tpu.vector_store %arg5[%c0_30, %c0_31, %c72], %46 {strides = array<i32>} : memref<2x8x128xf32, #tpu.memory_space<vmem>>, vector<2x8x8xf32>,
    %48 = vector.extract_strided_slice %17 {offsets = [0, 10, 0, 0], sizes = [2, 1, 8, 8], strides = [1, 1, 1, 1]} : vector<2x16x8x8xf32> to vector<2x1x8x8xf32>
    %49 = vector.shape_cast %48 : vector<2x1x8x8xf32> to vector<2x8x8xf32>
    %c0_32 = arith.constant 0 : index
    %c0_33 = arith.constant 0 : index
    %c80 = arith.constant 80 : index
    %50 = vector.load %arg5[%c0_32, %c0_33, %c80] : memref<2x8x128xf32, #tpu.memory_space<vmem>>, vector<2x8x8xf32>
    tpu.vector_store %arg5[%c0_32, %c0_33, %c80], %49 {strides = array<i32>} : memref<2x8x128xf32, #tpu.memory_space<vmem>>, vector<2x8x8xf32>,
    %51 = vector.extract_strided_slice %17 {offsets = [0, 11, 0, 0], sizes = [2, 1, 8, 8], strides = [1, 1, 1, 1]} : vector<2x16x8x8xf32> to vector<2x1x8x8xf32>
    %52 = vector.shape_cast %51 : vector<2x1x8x8xf32> to vector<2x8x8xf32>
    %c0_34 = arith.constant 0 : index
    %c0_35 = arith.constant 0 : index
    %c88 = arith.constant 88 : index
    %53 = vector.load %arg5[%c0_34, %c0_35, %c88] : memref<2x8x128xf32, #tpu.memory_space<vmem>>, vector<2x8x8xf32>
    tpu.vector_store %arg5[%c0_34, %c0_35, %c88], %52 {strides = array<i32>} : memref<2x8x128xf32, #tpu.memory_space<vmem>>, vector<2x8x8xf32>,
    %54 = vector.extract_strided_slice %17 {offsets = [0, 12, 0, 0], sizes = [2, 1, 8, 8], strides = [1, 1, 1, 1]} : vector<2x16x8x8xf32> to vector<2x1x8x8xf32>
    %55 = vector.shape_cast %54 : vector<2x1x8x8xf32> to vector<2x8x8xf32>
    %c0_36 = arith.constant 0 : index
    %c0_37 = arith.constant 0 : index
    %c96 = arith.constant 96 : index
    %56 = vector.load %arg5[%c0_36, %c0_37, %c96] : memref<2x8x128xf32, #tpu.memory_space<vmem>>, vector<2x8x8xf32>
    tpu.vector_store %arg5[%c0_36, %c0_37, %c96], %55 {strides = array<i32>} : memref<2x8x128xf32, #tpu.memory_space<vmem>>, vector<2x8x8xf32>,
    %57 = vector.extract_strided_slice %17 {offsets = [0, 13, 0, 0], sizes = [2, 1, 8, 8], strides = [1, 1, 1, 1]} : vector<2x16x8x8xf32> to vector<2x1x8x8xf32>
    %58 = vector.shape_cast %57 : vector<2x1x8x8xf32> to vector<2x8x8xf32>
    %c0_38 = arith.constant 0 : index
    %c0_39 = arith.constant 0 : index
    %c104 = arith.constant 104 : index
    %59 = vector.load %arg5[%c0_38, %c0_39, %c104] : memref<2x8x128xf32, #tpu.memory_space<vmem>>, vector<2x8x8xf32>
    tpu.vector_store %arg5[%c0_38, %c0_39, %c104], %58 {strides = array<i32>} : memref<2x8x128xf32, #tpu.memory_space<vmem>>, vector<2x8x8xf32>,
    %60 = vector.extract_strided_slice %17 {offsets = [0, 14, 0, 0], sizes = [2, 1, 8, 8], strides = [1, 1, 1, 1]} : vector<2x16x8x8xf32> to vector<2x1x8x8xf32>
    %61 = vector.shape_cast %60 : vector<2x1x8x8xf32> to vector<2x8x8xf32>
    %c0_40 = arith.constant 0 : index
    %c0_41 = arith.constant 0 : index
    %c112 = arith.constant 112 : index
    %62 = vector.load %arg5[%c0_40, %c0_41, %c112] : memref<2x8x128xf32, #tpu.memory_space<vmem>>, vector<2x8x8xf32>
    tpu.vector_store %arg5[%c0_40, %c0_41, %c112], %61 {strides = array<i32>} : memref<2x8x128xf32, #tpu.memory_space<vmem>>, vector<2x8x8xf32>,
    %63 = vector.extract_strided_slice %17 {offsets = [0, 15, 0, 0], sizes = [2, 1, 8, 8], strides = [1, 1, 1, 1]} : vector<2x16x8x8xf32> to vector<2x1x8x8xf32>
    %64 = vector.shape_cast %63 : vector<2x1x8x8xf32> to vector<2x8x8xf32>
    %c0_42 = arith.constant 0 : index
    %c0_43 = arith.constant 0 : index
    %c120 = arith.constant 120 : index
    %65 = vector.load %arg5[%c0_42, %c0_43, %c120] : memref<2x8x128xf32, #tpu.memory_space<vmem>>, vector<2x8x8xf32>
    tpu.vector_store %arg5[%c0_42, %c0_43, %c120], %64 {strides = array<i32>} : memref<2x8x128xf32, #tpu.memory_space<vmem>>, vector<2x8x8xf32>,
    return
  }
  func.func @transform_0(%arg0: i32, %arg1: i32) -> (i32, i32, i32) {
    %c0_i32 = arith.constant 0 : i32
    %c0_i32_0 = arith.constant 0 : i32
    return %arg0, %arg1, %c0_i32 : i32, i32, i32
  }
  func.func @transform_1(%arg0: i32, %arg1: i32) -> (i32, i32, i32) {
    %c0_i32 = arith.constant 0 : i32
    %c0_i32_0 = arith.constant 0 : i32
    %c0_i32_1 = arith.constant 0 : i32
    return %arg0, %c0_i32, %c0_i32_0 : i32, i32, i32
  }
  func.func @transform_2(%arg0: i32, %arg1: i32) -> (i32, i32, i32) {
    %c0_i32 = arith.constant 0 : i32
    %c0_i32_0 = arith.constant 0 : i32
    %c0_i32_1 = arith.constant 0 : i32
    return %arg0, %c0_i32, %c0_i32_0 : i32, i32, i32
  }
  func.func @transform_3(%arg0: i32, %arg1: i32) -> (i32, i32, i32) {
    %c0_i32 = arith.constant 0 : i32
    %c0_i32_0 = arith.constant 0 : i32
    return %arg0, %arg1, %c0_i32 : i32, i32, i32
  }
}

</mosaic_0001>

<bundles_post_ra>
// kernel: _lambda_.1
= control target key start
LH: loop header
LB: loop body
LE: loop exit
PB: predicated region body
PF: predicated region fallthrough
CT: control target
= control target key end

     0   :  { %vm111_vm0 = vcmask 64512   ;;  %v4397_v0 = vmov 0.0   ;;  %vm4398_vm1 = vmmov 0   ;;  %vm2003_vm2 = vcmask 1043456   ;;  %s4400_s9 = smov 16   ;;  %s4401_s10 = smov 24   ;;  %s5429_s1 = inlined_call_operand.vmem [shape: bf16[32,8,8], index: 1, kind: input, shape index: {}]   ;;  %s5430_s0 = inlined_call_operand.vmem [shape: bf16[32,8,8], index: 0, kind: input, shape index: {}]   ;;  %s5431_s2 = inlined_call_operand.vmem [shape: bf16[32,8,8], index: 2, kind: input, shape index: {}]   ;;  %s5432_s3 = inlined_call_operand.vmem [shape: f32[2,8,128], index: 3, kind: output, shape index: {}]  }
   0x1   :  { %3868 = vmatprep.subr.bf16.mxu0 %v4397_v0  ;;  %3874 = vmatprep.subr.bf16.mxu1 %v4397_v0  ;;  %v47_v1 = vld [vmem:[%s5429_s1] sm:$0xf]  ;;  %v48_v2 = vld [vmem:[%s5429_s1 + $0x4] sm:$0xf]  ;;  %v49_v5 = vld [vmem:[%s5429_s1 + $0x8] sm:$0xf] }
   0x2   :  { %v116_v3 = vsel %vm111_vm0, %v47_v1, 0  ;;  %v162_v4 = vsel %vm111_vm0, %v48_v2, 0  ;;  %3870 = vmatprep.mubr.msk.bf16.mxu0 %vm4398_vm1, %v4397_v0  ;;  %3876 = vmatprep.mubr.msk.bf16.mxu1 %vm4398_vm1, %v4397_v0  ;;  %v50_v6 = vld [vmem:[%s5429_s1 + $0xc] sm:$0xf]  ;;  %v15_v7 = vld [vmem:[%s5430_s0] sm:$0xf] }
   0x3   :  { %3869 = vmatpush3.bf16.xpose.msra.mxu0 %v116_v3  ;;  %3875 = vmatpush3.bf16.xpose.msra.mxu1 %v162_v4  ;;  %v16_v8 = vld [vmem:[%s5430_s0 + $0x4] sm:$0xf]  ;;  %v208_v9 = vsel %vm111_vm0, %v49_v5, 0  ;;  %v254_v10 = vsel %vm111_vm0, %v50_v6, 0  ;;  %v51_v11 = vld [vmem:[%s5429_s1 + $0x10] sm:$0xf] }
   0x4   :  { %3880 = vmatprep.subr.bf16.mxu0 %v4397_v0  ;;  %3886 = vmatprep.subr.bf16.mxu1 %v4397_v0  ;;  %v52_v12 = vld [vmem:[%s5429_s1 + $0x14] sm:$0xf]  ;;  %v17_v13 = vld [vmem:[%s5430_s0 + $0x8] sm:$0xf]  ;;  %v18_v14 = vld [vmem:[%s5430_s0 + $0xc] sm:$0xf] }
   0x5   :  { %v300_v15 = vsel %vm111_vm0, %v51_v11, 0  ;;  %v346_v16 = vsel %vm111_vm0, %v52_v12, 0  ;;  %v53_v17 = vld [vmem:[%s5429_s1 + $0x18] sm:$0xf]  ;;  %v54_v18 = vld [vmem:[%s5429_s1 + $0x1c] sm:$0xf] }
   0x6   :  { %v19_v19 = vld [vmem:[%s5430_s0 + $0x10] sm:$0xf]  ;;  %v20_v20 = vld [vmem:[%s5430_s0 + $0x14] sm:$0xf]  ;;  %v392_v21 = vsel %vm111_vm0, %v53_v17, 0  ;;  %v438_v22 = vsel %vm111_vm0, %v54_v18, 0 }
   0x7   :  { %v55_v23 = vld [vmem:[%s5429_s1 + $0x20] sm:$0xf]  ;;  %v56_v24 = vld [vmem:[%s5429_s1 + $0x24] sm:$0xf]  ;;  %v21_v25 = vld [vmem:[%s5430_s0 + $0x18] sm:$0xf] }
   0x8   :  { %v22_v26 = vld [vmem:[%s5430_s0 + $0x1c] sm:$0xf]  ;;  %v484_v27 = vsel %vm111_vm0, %v55_v23, 0  ;;  %v530_v28 = vsel %vm111_vm0, %v56_v24, 0  ;;  %v57_v29 = vld [vmem:[%s5429_s1 + $0x28] sm:$0xf] }
   0x9   :  { %v58_v30 = vld [vmem:[%s5429_s1 + $0x2c] sm:$0xf]  ;;  %v23_v31 = vld [vmem:[%s5430_s0 + $0x20] sm:$0xf]  ;;  %v24_v32 = vld [vmem:[%s5430_s0 + $0x24] sm:$0xf] }
   0xa   :  { %3871 = vmatmul.mubr.msk.bf16.vlgmr.msra.gmra.mxu0 %vm111_vm0, %v15_v7  ;;  %3877 = vmatmul.mubr.msk.bf16.vlgmr.msra.gmra.mxu1 %vm111_vm0, %v16_v8  ;;  %v576_v33 = vsel %vm111_vm0, %v57_v29, 0  ;;  %v622_v34 = vsel %vm111_vm0, %v58_v30, 0  ;;  %v59_v35 = vld [vmem:[%s5429_s1 + $0x30] sm:$0xf]  ;;  %v60_v36 = vld [vmem:[%s5429_s1 + $0x34] sm:$0xf] }
   0xb   :  { %3881 = vmatpush3.bf16.xpose.msra.mxu0 %v208_v9  ;;  %3887 = vmatpush3.bf16.xpose.msra.mxu1 %v254_v10  ;;  %v25_v37 = vld [vmem:[%s5430_s0 + $0x28] sm:$0xf]  ;;  %v26_v38 = vld [vmem:[%s5430_s0 + $0x2c] sm:$0xf]  ;;  %v668_v39 = vsel %vm111_vm0, %v59_v35, 0  ;;  %v714_v40 = vsel %vm111_vm0, %v60_v36, 0 }
   0xc   :  { %3882 = vmatprep.mubr.msk.bf16.mxu0 %vm4398_vm1, %v4397_v0  ;;  %3888 = vmatprep.mubr.msk.bf16.mxu1 %vm4398_vm1, %v4397_v0  ;;  %v61_v41 = vld [vmem:[%s5429_s1 + $0x38] sm:$0xf]  ;;  %v62_v42 = vld [vmem:[%s5429_s1 + $0x3c] sm:$0xf]  ;;  %v27_v43 = vld [vmem:[%s5430_s0 + $0x30] sm:$0xf] }
   0xd   :  { %3892 = vmatprep.subr.bf16.mxu0 %v4397_v0  ;;  %3898 = vmatprep.subr.bf16.mxu1 %v4397_v0  ;;  %v28_v44 = vld [vmem:[%s5430_s0 + $0x34] sm:$0xf]  ;;  %v760_v45 = vsel %vm111_vm0, %v61_v41, 0  ;;  %v806_v46 = vsel %vm111_vm0, %v62_v42, 0  ;;  %v63_v47 = vld [vmem:[%s5429_s1 + $0x40] sm:$0xf] }
   0xe   :  { %v64_v48 = vld [vmem:[%s5429_s1 + $0x44] sm:$0xf]  ;;  %v29_v49 = vld [vmem:[%s5430_s0 + $0x38] sm:$0xf]  ;;  %v30_v50 = vld [vmem:[%s5430_s0 + $0x3c] sm:$0xf] }
   0xf   :  { %v852_v51 = vsel %vm111_vm0, %v63_v47, 0  ;;  %v898_v52 = vsel %vm111_vm0, %v64_v48, 0  ;;  %v65_v53 = vld [vmem:[%s5429_s1 + $0x48] sm:$0xf]  ;;  %v66_v54 = vld [vmem:[%s5429_s1 + $0x4c] sm:$0xf] }
  0x10   :  { %v31_v55 = vld [vmem:[%s5430_s0 + $0x40] sm:$0xf]  ;;  %v32_v56 = vld [vmem:[%s5430_s0 + $0x44] sm:$0xf]  ;;  %v944_v57 = vsel %vm111_vm0, %v65_v53, 0  ;;  %v990_v58 = vsel %vm111_vm0, %v66_v54, 0 }
  0x11   :  { %v67_v59 = vld [vmem:[%s5429_s1 + $0x50] sm:$0xf]  ;;  %v68_v60 = vld [vmem:[%s5429_s1 + $0x54] sm:$0xf]  ;;  %v33_v61 = vld [vmem:[%s5430_s0 + $0x48] sm:$0xf] }
  0x12   :  { %3883 = vmatmul.mubr.msk.bf16.vlgmr.msra.gmra.mxu0 %vm111_vm0, %v17_v13  ;;  %3889 = vmatmul.mubr.msk.bf16.vlgmr.msra.gmra.mxu1 %vm111_vm0, %v18_v14  ;;  %v34_v62 = vld [vmem:[%s5430_s0 + $0x4c] sm:$0xf]  ;;  %v1036_v63 = vsel %vm111_vm0, %v67_v59, 0  ;;  %v1082_v1 = vsel %vm111_vm0, %v68_v60, 0  ;;  %v69_v2 = vld [vmem:[%s5429_s1 + $0x58] sm:$0xf] }
  0x13   :  { %3893 = vmatpush3.bf16.xpose.msra.mxu0 %v300_v15  ;;  %3899 = vmatpush3.bf16.xpose.msra.mxu1 %v346_v16  ;;  %v70_v3 = vld [vmem:[%s5429_s1 + $0x5c] sm:$0xf]  ;;  %v35_v4 = vld [vmem:[%s5430_s0 + $0x50] sm:$0xf]  ;;  %v36_v5 = vld [vmem:[%s5430_s0 + $0x54] sm:$0xf] }
  0x14   :  { %3894 = vmatprep.mubr.msk.bf16.mxu0 %vm4398_vm1, %v4397_v0  ;;  %3900 = vmatprep.mubr.msk.bf16.mxu1 %vm4398_vm1, %v4397_v0  ;;  %v1128_v6 = vsel %vm111_vm0, %v69_v2, 0  ;;  %v1174_v7 = vsel %vm111_vm0, %v70_v3, 0  ;;  %v71_v8 = vld [vmem:[%s5429_s1 + $0x60] sm:$0xf]  ;;  %v72_v9 = vld [vmem:[%s5429_s1 + $0x64] sm:$0xf] }
  0x15   :  { %3904 = vmatprep.subr.bf16.mxu0 %v4397_v0  ;;  %3910 = vmatprep.subr.bf16.mxu1 %v4397_v0  ;;  %v37_v10 = vld [vmem:[%s5430_s0 + $0x58] sm:$0xf]  ;;  %v38_v11 = vld [vmem:[%s5430_s0 + $0x5c] sm:$0xf]  ;;  %v1220_v12 = vsel %vm111_vm0, %v71_v8, 0  ;;  %v1266_v13 = vsel %vm111_vm0, %v72_v9, 0 }
  0x16   :  { %v73_v14 = vld [vmem:[%s5429_s1 + $0x68] sm:$0xf]  ;;  %v74_v15 = vld [vmem:[%s5429_s1 + $0x6c] sm:$0xf]  ;;  %v39_v16 = vld [vmem:[%s5430_s0 + $0x60] sm:$0xf] }
  0x17   :  { %v40_v17 = vld [vmem:[%s5430_s0 + $0x64] sm:$0xf]  ;;  %v1312_v18 = vsel %vm111_vm0, %v73_v14, 0  ;;  %v42_v23 = vld [vmem:[%s5430_s0 + $0x6c] sm:$0xf]  ;;  %s4402_s11 = smov 32  }
  0x18   :  { %v44_v29 = vld [vmem:[%s5430_s0 + $0x74] sm:$0xf]  ;;  %v79_v9 = vld [vmem:[%s5431_s2] sm:$0xf]  ;;  %s4403_s12 = smov 40   ;;  %s4404_s13 = smov 48  }
  0x19   :  { %s4405_s16 = smov 56   ;;  %s4406_s17 = smov 64   ;;  %vm3515_vm3 = vcmask 130112   ;;  %vm3526_vm4 = vcmask 195712   ;;  %vm3537_vm5 = vcmask 261312   ;;  %vm3548_vm6 = vcmask 326912  }
  0x1a   :  { %3895 = vmatmul.mubr.msk.bf16.vlgmr.msra.gmra.mxu0 %vm111_vm0, %v19_v19  ;;  %3901 = vmatmul.mubr.msk.bf16.vlgmr.msra.gmra.mxu1 %vm111_vm0, %v20_v20  ;;  %v1358_v19 = vsel %vm111_vm0, %v74_v15, 0  ;;  %v75_v20 = vld [vmem:[%s5429_s1 + $0x70] sm:$0xf]  ;;  %s4407_s18 = smov 72   ;;  %s4408_s19 = smov 80   ;;  %vm3559_vm7 = vcmask 392512  }
  0x1b   :  { %3905 = vmatpush3.bf16.xpose.msra.mxu0 %v392_v21  ;;  %3911 = vmatpush3.bf16.xpose.msra.mxu1 %v438_v22  ;;  %v76_v21 = vld [vmem:[%s5429_s1 + $0x74] sm:$0xf]  ;;  %v41_v22 = vld [vmem:[%s5430_s0 + $0x68] sm:$0xf]  ;;  %v1404_v24 = vsel %vm111_vm0, %v75_v20, 0  ;;  %s4409_s20 = smov 88  }
  0x1c   :  { %3906 = vmatprep.mubr.msk.bf16.mxu0 %vm4398_vm1, %v4397_v0  ;;  %3912 = vmatprep.mubr.msk.bf16.mxu1 %vm4398_vm1, %v4397_v0  ;;  %s4410_s21 = smov 96   ;;  %s4411_s22 = smov 104   ;;  %vm3570_vm8 = vcmask 458112   ;;  %vm3581_vm9 = vcmask 523712   ;;  %vm3592_vm10 = vcmask 589312   ;;  %vm3603_vm11 = vcmask 654912  }
  0x1d   :  { %3916 = vmatprep.subr.bf16.mxu0 %v4397_v0  ;;  %3922 = vmatprep.subr.bf16.mxu1 %v4397_v0  ;;  %s4412_s23 = smov 112   ;;  %s4413_s24 = smov 120   ;;  %vm3614_vm12 = vcmask 720512   ;;  %vm3625_vm13 = vcmask 786112   ;;  %vm3636_vm14 = vcmask 851712   ;;  %vm3647_vm15 = vcmask 917312  }
  0x22   :  { %3907 = vmatmul.mubr.msk.bf16.vlgmr.msra.gmra.mxu0 %vm111_vm0, %v21_v25  ;;  %3913 = vmatmul.mubr.msk.bf16.vlgmr.msra.gmra.mxu1 %vm111_vm0, %v22_v26  ;;  %v1450_v25 = vsel %vm111_vm0, %v76_v21, 0  ;;  %v77_v26 = vld [vmem:[%s5429_s1 + $0x78] sm:$0xf] }
  0x23   :  { %3917 = vmatpush3.bf16.xpose.msra.mxu0 %v484_v27  ;;  %3923 = vmatpush3.bf16.xpose.msra.mxu1 %v530_v28  ;;  %v78_v27 = vld [vmem:[%s5429_s1 + $0x7c] sm:$0xf]  ;;  %v43_v28 = vld [vmem:[%s5430_s0 + $0x70] sm:$0xf]  ;;  %v1496_v30 = vsel %vm111_vm0, %v77_v26, 0 }
  0x24   :  { %3918 = vmatprep.mubr.msk.bf16.mxu0 %vm4398_vm1, %v4397_v0  ;;  %3924 = vmatprep.mubr.msk.bf16.mxu1 %vm4398_vm1, %v4397_v0 }
  0x25   :  { %3928 = vmatprep.subr.bf16.mxu0 %v4397_v0  ;;  %3934 = vmatprep.subr.bf16.mxu1 %v4397_v0 }
  0x2a   :  { %3919 = vmatmul.mubr.msk.bf16.vlgmr.msra.gmra.mxu0 %vm111_vm0, %v23_v31  ;;  %3925 = vmatmul.mubr.msk.bf16.vlgmr.msra.gmra.mxu1 %vm111_vm0, %v24_v32  ;;  %v1542_v31 = vsel %vm111_vm0, %v78_v27, 0  ;;  %v45_v32 = vld [vmem:[%s5430_s0 + $0x78] sm:$0xf] }
  0x2b   :  { %3929 = vmatpush3.bf16.xpose.msra.mxu0 %v576_v33  ;;  %3935 = vmatpush3.bf16.xpose.msra.mxu1 %v622_v34  ;;  %v46_v33 = vld [vmem:[%s5430_s0 + $0x7c] sm:$0xf] }
  0x2c   :  { %3930 = vmatprep.mubr.msk.bf16.mxu0 %vm4398_vm1, %v4397_v0  ;;  %3936 = vmatprep.mubr.msk.bf16.mxu1 %vm4398_vm1, %v4397_v0 }
  0x2d   :  { %3940 = vmatprep.subr.bf16.mxu0 %v4397_v0  ;;  %3946 = vmatprep.subr.bf16.mxu1 %v4397_v0 }
  0x32   :  { %3931 = vmatmul.mubr.msk.bf16.vlgmr.msra.gmra.mxu0 %vm111_vm0, %v25_v37  ;;  %3937 = vmatmul.mubr.msk.bf16.vlgmr.msra.gmra.mxu1 %vm111_vm0, %v26_v38 }
  0x33   :  { %3941 = vmatpush3.bf16.xpose.msra.mxu0 %v668_v39  ;;  %3947 = vmatpush3.bf16.xpose.msra.mxu1 %v714_v40 }
  0x34   :  { %3942 = vmatprep.mubr.msk.bf16.mxu0 %vm4398_vm1, %v4397_v0  ;;  %3948 = vmatprep.mubr.msk.bf16.mxu1 %vm4398_vm1, %v4397_v0 }
  0x35   :  { %3952 = vmatprep.subr.bf16.mxu0 %v4397_v0  ;;  %3958 = vmatprep.subr.bf16.mxu1 %v4397_v0 }
  0x3a   :  { %3943 = vmatmul.mubr.msk.bf16.vlgmr.msra.gmra.mxu0 %vm111_vm0, %v27_v43  ;;  %3949 = vmatmul.mubr.msk.bf16.vlgmr.msra.gmra.mxu1 %vm111_vm0, %v28_v44 }
  0x3b   :  { %3953 = vmatpush3.bf16.xpose.msra.mxu0 %v760_v45  ;;  %3959 = vmatpush3.bf16.xpose.msra.mxu1 %v806_v46 }
  0x3c   :  { %3954 = vmatprep.mubr.msk.bf16.mxu0 %vm4398_vm1, %v4397_v0  ;;  %3960 = vmatprep.mubr.msk.bf16.mxu1 %vm4398_vm1, %v4397_v0 }
  0x3d   :  { %3964 = vmatprep.subr.bf16.mxu0 %v4397_v0  ;;  %3970 = vmatprep.subr.bf16.mxu1 %v4397_v0 }
  0x42   :  { %3955 = vmatmul.mubr.msk.bf16.vlgmr.msra.gmra.mxu0 %vm111_vm0, %v29_v49  ;;  %3961 = vmatmul.mubr.msk.bf16.vlgmr.msra.gmra.mxu1 %vm111_vm0, %v30_v50 }
  0x43   :  { %3965 = vmatpush3.bf16.xpose.msra.mxu0 %v852_v51  ;;  %3971 = vmatpush3.bf16.xpose.msra.mxu1 %v898_v52 }
  0x44   :  { %3966 = vmatprep.mubr.msk.bf16.mxu0 %vm4398_vm1, %v4397_v0  ;;  %3972 = vmatprep.mubr.msk.bf16.mxu1 %vm4398_vm1, %v4397_v0 }
  0x45   :  { %3976 = vmatprep.subr.bf16.mxu0 %v4397_v0  ;;  %3982 = vmatprep.subr.bf16.mxu1 %v4397_v0 }
  0x4a   :  { %3967 = vmatmul.mubr.msk.bf16.vlgmr.msra.gmra.mxu0 %vm111_vm0, %v31_v55  ;;  %3973 = vmatmul.mubr.msk.bf16.vlgmr.msra.gmra.mxu1 %vm111_vm0, %v32_v56 }
  0x4b   :  { %3977 = vmatpush3.bf16.xpose.msra.mxu0 %v944_v57  ;;  %3983 = vmatpush3.bf16.xpose.msra.mxu1 %v990_v58 }
  0x4c   :  { %3978 = vmatprep.mubr.msk.bf16.mxu0 %vm4398_vm1, %v4397_v0  ;;  %3984 = vmatprep.mubr.msk.bf16.mxu1 %vm4398_vm1, %v4397_v0 }
  0x4d   :  { %3988 = vmatprep.subr.bf16.mxu0 %v4397_v0  ;;  %3994 = vmatprep.subr.bf16.mxu1 %v4397_v0 }
  0x52   :  { %3979 = vmatmul.mubr.msk.bf16.vlgmr.msra.gmra.mxu0 %vm111_vm0, %v33_v61  ;;  %3985 = vmatmul.mubr.msk.bf16.vlgmr.msra.gmra.mxu1 %vm111_vm0, %v34_v62 }
  0x53   :  { %3989 = vmatpush3.bf16.xpose.msra.mxu0 %v1036_v63  ;;  %3995 = vmatpush3.bf16.xpose.msra.mxu1 %v1082_v1 }
  0x54   :  { %3990 = vmatprep.mubr.msk.bf16.mxu0 %vm4398_vm1, %v4397_v0  ;;  %3996 = vmatprep.mubr.msk.bf16.mxu1 %vm4398_vm1, %v4397_v0 }
  0x55   :  { %4000 = vmatprep.subr.bf16.mxu0 %v4397_v0  ;;  %4006 = vmatprep.subr.bf16.mxu1 %v4397_v0 }
  0x5a   :  { %3991 = vmatmul.mubr.msk.bf16.vlgmr.msra.gmra.mxu0 %vm111_vm0, %v35_v4  ;;  %3997 = vmatmul.mubr.msk.bf16.vlgmr.msra.gmra.mxu1 %vm111_vm0, %v36_v5 }
  0x5b   :  { %4001 = vmatpush3.bf16.xpose.msra.mxu0 %v1128_v6  ;;  %4007 = vmatpush3.bf16.xpose.msra.mxu1 %v1174_v7 }
  0x5c   :  { %4002 = vmatprep.mubr.msk.bf16.mxu0 %vm4398_vm1, %v4397_v0  ;;  %4008 = vmatprep.mubr.msk.bf16.mxu1 %vm4398_vm1, %v4397_v0 }
  0x5d   :  { %4012 = vmatprep.subr.bf16.mxu0 %v4397_v0  ;;  %4018 = vmatprep.subr.bf16.mxu1 %v4397_v0 }
  0x62   :  { %4003 = vmatmul.mubr.msk.bf16.vlgmr.msra.gmra.mxu0 %vm111_vm0, %v37_v10  ;;  %4009 = vmatmul.mubr.msk.bf16.vlgmr.msra.gmra.mxu1 %vm111_vm0, %v38_v11  ;;  %v2005_v10 = vsel %vm2003_vm2, %v79_v9, 0 }
  0x63   :  { %4013 = vmatpush3.bf16.xpose.msra.mxu0 %v1220_v12  ;;  %4019 = vmatpush3.bf16.xpose.msra.mxu1 %v1266_v13 }
  0x64   :  { %4014 = vmatprep.mubr.msk.bf16.mxu0 %vm4398_vm1, %v4397_v0  ;;  %4020 = vmatprep.mubr.msk.bf16.mxu1 %vm4398_vm1, %v4397_v0 }
  0x65   :  { %4024 = vmatprep.subr.bf16.mxu0 %v4397_v0  ;;  %4030 = vmatprep.subr.bf16.mxu1 %v4397_v0 }
  0x6a   :  { %4015 = vmatmul.mubr.msk.bf16.vlgmr.msra.gmra.mxu0 %vm111_vm0, %v39_v16  ;;  %4021 = vmatmul.mubr.msk.bf16.vlgmr.msra.gmra.mxu1 %vm111_vm0, %v40_v17  ;;  %v80_v17 = vld [vmem:[%s5431_s2 + $0x4] sm:$0xf] }
  0x6b   :  { %4025 = vmatpush3.bf16.xpose.msra.mxu0 %v1312_v18  ;;  %4031 = vmatpush3.bf16.xpose.msra.mxu1 %v1358_v19  ;;  %v2051_v20 = vsel %vm2003_vm2, %v80_v17, 0 }
  0x6c   :  { %4026 = vmatprep.mubr.msk.bf16.mxu0 %vm4398_vm1, %v4397_v0  ;;  %4032 = vmatprep.mubr.msk.bf16.mxu1 %vm4398_vm1, %v4397_v0 }
  0x6d   :  { %4036 = vmatprep.subr.bf16.mxu0 %v4397_v0  ;;  %4042 = vmatprep.subr.bf16.mxu1 %v4397_v0 }
  0x72   :  { %4027 = vmatmul.mubr.msk.bf16.vlgmr.msra.gmra.mxu0 %vm111_vm0, %v41_v22  ;;  %4033 = vmatmul.mubr.msk.bf16.vlgmr.msra.gmra.mxu1 %vm111_vm0, %v42_v23 }
  0x73   :  { %4037 = vmatpush3.bf16.xpose.msra.mxu0 %v1404_v24  ;;  %4043 = vmatpush3.bf16.xpose.msra.mxu1 %v1450_v25 }
  0x74   :  { %4038 = vmatprep.mubr.msk.bf16.mxu0 %vm4398_vm1, %v4397_v0  ;;  %4044 = vmatprep.mubr.msk.bf16.mxu1 %vm4398_vm1, %v4397_v0 }
  0x75   :  { %4048 = vmatprep.subr.bf16.mxu0 %v4397_v0  ;;  %4054 = vmatprep.subr.bf16.mxu1 %v4397_v0 }
  0x7a   :  { %4039 = vmatmul.mubr.msk.bf16.vlgmr.msra.gmra.mxu0 %vm111_vm0, %v43_v28  ;;  %4045 = vmatmul.mubr.msk.bf16.vlgmr.msra.gmra.mxu1 %vm111_vm0, %v44_v29 }
  0x7b   :  { %4049 = vmatpush3.bf16.xpose.msra.mxu0 %v1496_v30  ;;  %4055 = vmatpush3.bf16.xpose.msra.mxu1 %v1542_v31 }
  0x7c   :  { %4050 = vmatprep.mubr.msk.bf16.mxu0 %vm4398_vm1, %v4397_v0  ;;  %4056 = vmatprep.mubr.msk.bf16.mxu1 %vm4398_vm1, %v4397_v0 }
  0x7d   :  { %4060 = vmatprep.subr.bf16.mxu0 %v4397_v0  ;;  %4066 = vmatprep.subr.bf16.mxu1 %v4397_v0 }
  0x82   :  { %4051 = vmatmul.mubr.msk.bf16.vlgmr.msra.gmra.mxu0 %vm111_vm0, %v45_v32  ;;  %4057 = vmatmul.mubr.msk.bf16.vlgmr.msra.gmra.mxu1 %vm111_vm0, %v46_v33 }
  0x83   :  { %4062 = vmatprep.mubr.msk.bf16.mxu0 %vm4398_vm1, %v4397_v0  ;;  %4068 = vmatprep.mubr.msk.bf16.mxu1 %vm4398_vm1, %v4397_v0 }
  0x84   :  { %4061 = vmatpush3.bf16.msra.mxu0 %v2005_v10  ;;  %4067 = vmatpush3.bf16.msra.mxu1 %v2051_v20 }
  0x85   :  { %4072 = vmatprep.subr.bf16.mxu0 %v4397_v0  ;;  %4078 = vmatprep.subr.bf16.mxu1 %v4397_v0 }
  0xca   :  { %v4792_v34 = vpop.f32.mrf.mxu0  ;;  %v4794_v35 = vpop.f32.mrf.mxu1 }
  0xcb   :  { %v1584_v36 = vsel %vm111_vm0, %v4792_v34, -inf  ;;  %v1587_v39 = vsel %vm111_vm0, %v4794_v35, -inf }
  0xcc   :  { %v3878_v37 = vpop.f32.mrf.mxu1  ;;  %1585 = vmax.xlane.f32.xlu0 %v1584_v36  ;;  %v3872_v38 = vpop.f32.mrf.mxu0 }
  0xce   :  { %v155_v40 = vpop.f32.mrf.mxu0  ;;  %v201_v41 = vpop.f32.mrf.mxu1 }
  0xd0   :  { %v3879_v42 = vpop.f32.mrf.mxu1  ;;  %1588 = vmax.xlane.f32.xlu0 %v1587_v39  ;;  %v3873_v43 = vpop.f32.mrf.mxu0 }
  0xd2   :  { %v4800_v44 = vpop.f32.mrf.mxu0  ;;  %v4802_v45 = vpop.f32.mrf.mxu1 }
  0xd3   :  { %v1590_v46 = vsel %vm111_vm0, %v4800_v44, -inf  ;;  %v1593_v49 = vsel %vm111_vm0, %v4802_v45, -inf }
  0xd4   :  { %v3890_v47 = vpop.f32.mrf.mxu1  ;;  %1591 = vmax.xlane.f32.xlu1 %v1590_v46  ;;  %v3884_v48 = vpop.f32.mrf.mxu0 }
  0xd6   :  { %v247_v50 = vpop.f32.mrf.mxu0  ;;  %v293_v51 = vpop.f32.mrf.mxu1 }
  0xd8   :  { %v3891_v52 = vpop.f32.mrf.mxu1  ;;  %1594 = vmax.xlane.f32.xlu1 %v1593_v49  ;;  %v3885_v53 = vpop.f32.mrf.mxu0 }
  0xda   :  { %v4808_v54 = vpop.f32.mrf.mxu0  ;;  %v4810_v55 = vpop.f32.mrf.mxu1 }
  0xdb   :  { %v1599_v56 = vsel %vm111_vm0, %v4810_v55, -inf  ;;  %v1596_v57 = vsel %vm111_vm0, %v4808_v54, -inf }
  0xdc   :  { %v3902_v58 = vpop.f32.mrf.mxu1  ;;  %1600 = vmax.xlane.f32.xlu1 %v1599_v56  ;;  %1597 = vmax.xlane.f32.xlu0 %v1596_v57  ;;  %v3896_v59 = vpop.f32.mrf.mxu0 }
  0xde   :  { %v339_v60 = vpop.f32.mrf.mxu0  ;;  %v385_v61 = vpop.f32.mrf.mxu1 }
  0xe0   :  { %v3897_v62 = vpop.f32.mrf.mxu0  ;;  %v3903_v63 = vpop.f32.mrf.mxu1 }
  0xe2   :  { %v4816_v1 = vpop.f32.mrf.mxu0  ;;  %v4818_v2 = vpop.f32.mrf.mxu1 }
  0xe3   :  { %v1605_v3 = vsel %vm111_vm0, %v4818_v2, -inf  ;;  %v1602_v4 = vsel %vm111_vm0, %v4816_v1, -inf }
  0xe4   :  { %v3914_v5 = vpop.f32.mrf.mxu1  ;;  %1606 = vmax.xlane.f32.xlu1 %v1605_v3  ;;  %1603 = vmax.xlane.f32.xlu0 %v1602_v4  ;;  %v3908_v6 = vpop.f32.mrf.mxu0 }
  0xe6   :  { %v431_v7 = vpop.f32.mrf.mxu0  ;;  %v477_v8 = vpop.f32.mrf.mxu1 }
  0xe8   :  { %v3909_v11 = vpop.f32.mrf.mxu0  ;;  %v3915_v12 = vpop.f32.mrf.mxu1 }
  0xea   :  { %v4829_v13 = vpop.f32.mrf.mxu0  ;;  %v4831_v14 = vpop.f32.mrf.mxu1 }
  0xeb   :  { %v1611_v15 = vsel %vm111_vm0, %v4831_v14, -inf  ;;  %v1608_v16 = vsel %vm111_vm0, %v4829_v13, -inf }
  0xec   :  { %v3926_v18 = vpop.f32.mrf.mxu1  ;;  %1612 = vmax.xlane.f32.xlu1 %v1611_v15  ;;  %1609 = vmax.xlane.f32.xlu0 %v1608_v16  ;;  %v3920_v19 = vpop.f32.mrf.mxu0 }
  0xee   :  { %v523_v21 = vpop.f32.mrf.mxu0  ;;  %v569_v22 = vpop.f32.mrf.mxu1 }
  0xf0   :  { %v3921_v23 = vpop.f32.mrf.mxu0  ;;  %v3927_v24 = vpop.f32.mrf.mxu1 }
  0xf2   :  { %v4842_v25 = vpop.f32.mrf.mxu0  ;;  %v4844_v26 = vpop.f32.mrf.mxu1 }
  0xf3   :  { %v1617_v27 = vsel %vm111_vm0, %v4844_v26, -inf  ;;  %v1614_v28 = vsel %vm111_vm0, %v4842_v25, -inf }
  0xf4   :  { %v3938_v29 = vpop.f32.mrf.mxu1  ;;  %1618 = vmax.xlane.f32.xlu1 %v1617_v27  ;;  %1615 = vmax.xlane.f32.xlu0 %v1614_v28  ;;  %v3932_v30 = vpop.f32.mrf.mxu0 }
  0xf6   :  { %v615_v31 = vpop.f32.mrf.mxu0  ;;  %v661_v32 = vpop.f32.mrf.mxu1 }
  0xf8   :  { %v3933_v33 = vpop.f32.mrf.mxu0  ;;  %v3939_v36 = vpop.f32.mrf.mxu1 }
  0xfa   :  { %v4850_v37 = vpop.f32.mrf.mxu0  ;;  %v4852_v38 = vpop.f32.mrf.mxu1 }
  0xfb   :  { %v1623_v39 = vsel %vm111_vm0, %v4852_v38, -inf  ;;  %v1620_v40 = vsel %vm111_vm0, %v4850_v37, -inf }
  0xfc   :  { %v3950_v41 = vpop.f32.mrf.mxu1  ;;  %1624 = vmax.xlane.f32.xlu1 %v1623_v39  ;;  %1621 = vmax.xlane.f32.xlu0 %v1620_v40  ;;  %v3944_v42 = vpop.f32.mrf.mxu0 }
  0xfe   :  { %v707_v43 = vpop.f32.mrf.mxu0  ;;  %v753_v46 = vpop.f32.mrf.mxu1 }
 0x100   :  { %v3945_v47 = vpop.f32.mrf.mxu0  ;;  %v3951_v48 = vpop.f32.mrf.mxu1 }
 0x102   :  { %v4858_v49 = vpop.f32.mrf.mxu0  ;;  %v4860_v50 = vpop.f32.mrf.mxu1 }
 0x103   :  { %v1629_v51 = vsel %vm111_vm0, %v4860_v50, -inf  ;;  %v1626_v52 = vsel %vm111_vm0, %v4858_v49, -inf }
 0x104   :  { %v3962_v53 = vpop.f32.mrf.mxu1  ;;  %1630 = vmax.xlane.f32.xlu1 %v1629_v51  ;;  %1627 = vmax.xlane.f32.xlu0 %v1626_v52  ;;  %v3956_v56 = vpop.f32.mrf.mxu0 }
 0x106   :  { %v799_v57 = vpop.f32.mrf.mxu0  ;;  %v845_v58 = vpop.f32.mrf.mxu1 }
 0x108   :  { %v3957_v59 = vpop.f32.mrf.mxu0  ;;  %v3963_v60 = vpop.f32.mrf.mxu1 }
 0x10a   :  { %v4866_v61 = vpop.f32.mrf.mxu0  ;;  %v4868_v62 = vpop.f32.mrf.mxu1 }
 0x10b   :  { %v1635_v63 = vsel %vm111_vm0, %v4868_v62, -inf  ;;  %v1632_v3 = vsel %vm111_vm0, %v4866_v61, -inf }
 0x10c   :  { %v3974_v4 = vpop.f32.mrf.mxu1  ;;  %1636 = vmax.xlane.f32.xlu1 %v1635_v63  ;;  %1633 = vmax.xlane.f32.xlu0 %v1632_v3  ;;  %v3968_v5 = vpop.f32.mrf.mxu0 }
 0x10e   :  { %v891_v6 = vpop.f32.mrf.mxu0  ;;  %v937_v7 = vpop.f32.mrf.mxu1 }
 0x110   :  { %v3969_v8 = vpop.f32.mrf.mxu0  ;;  %v3975_v9 = vpop.f32.mrf.mxu1 }
 0x112   :  { %v4874_v10 = vpop.f32.mrf.mxu0  ;;  %v4876_v11 = vpop.f32.mrf.mxu1 }
 0x113   :  { %v1641_v12 = vsel %vm111_vm0, %v4876_v11, -inf  ;;  %v1638_v15 = vsel %vm111_vm0, %v4874_v10, -inf }
 0x114   :  { %v3986_v16 = vpop.f32.mrf.mxu1  ;;  %1642 = vmax.xlane.f32.xlu1 %v1641_v12  ;;  %1639 = vmax.xlane.f32.xlu0 %v1638_v15  ;;  %v3980_v17 = vpop.f32.mrf.mxu0 }
 0x116   :  { %v983_v18 = vpop.f32.mrf.mxu0  ;;  %v1029_v19 = vpop.f32.mrf.mxu1 }
 0x118   :  { %v3981_v20 = vpop.f32.mrf.mxu0  ;;  %v3987_v21 = vpop.f32.mrf.mxu1 }
 0x11a   :  { %v4882_v22 = vpop.f32.mrf.mxu0  ;;  %v4884_v23 = vpop.f32.mrf.mxu1 }
 0x11b   :  { %v1647_v24 = vsel %vm111_vm0, %v4884_v23, -inf  ;;  %v1644_v27 = vsel %vm111_vm0, %v4882_v22, -inf }
 0x11c   :  { %v3998_v28 = vpop.f32.mrf.mxu1  ;;  %1648 = vmax.xlane.f32.xlu1 %v1647_v24  ;;  %1645 = vmax.xlane.f32.xlu0 %v1644_v27  ;;  %v3992_v29 = vpop.f32.mrf.mxu0 }
 0x11e   :  { %v1075_v30 = vpop.f32.mrf.mxu0  ;;  %v1121_v31 = vpop.f32.mrf.mxu1 }
 0x120   :  { %v3993_v32 = vpop.f32.mrf.mxu0  ;;  %v3999_v33 = vpop.f32.mrf.mxu1 }
 0x122   :  { %v4890_v36 = vpop.f32.mrf.mxu0  ;;  %v4892_v39 = vpop.f32.mrf.mxu1 }
 0x123   :  { %v1653_v40 = vsel %vm111_vm0, %v4892_v39, -inf  ;;  %v1650_v41 = vsel %vm111_vm0, %v4890_v36, -inf }
 0x124   :  { %v4010_v42 = vpop.f32.mrf.mxu1  ;;  %1654 = vmax.xlane.f32.xlu1 %v1653_v40  ;;  %1651 = vmax.xlane.f32.xlu0 %v1650_v41  ;;  %v4004_v43 = vpop.f32.mrf.mxu0 }
 0x126   :  { %v1167_v46 = vpop.f32.mrf.mxu0  ;;  %v1213_v47 = vpop.f32.mrf.mxu1 }
 0x128   :  { %v4005_v48 = vpop.f32.mrf.mxu0  ;;  %v4011_v51 = vpop.f32.mrf.mxu1 }
 0x12a   :  { %v4898_v52 = vpop.f32.mrf.mxu0  ;;  %v4900_v53 = vpop.f32.mrf.mxu1 }
 0x12b   :  { %v1659_v56 = vsel %vm111_vm0, %v4900_v53, -inf  ;;  %v1656_v57 = vsel %vm111_vm0, %v4898_v52, -inf }
 0x12c   :  { %v4022_v58 = vpop.f32.mrf.mxu1  ;;  %1660 = vmax.xlane.f32.xlu1 %v1659_v56  ;;  %1657 = vmax.xlane.f32.xlu0 %v1656_v57  ;;  %v4016_v59 = vpop.f32.mrf.mxu0 }
 0x12e   :  { %v1259_v60 = vpop.f32.mrf.mxu0  ;;  %v1305_v63 = vpop.f32.mrf.mxu1 }
 0x130   :  { %v4017_v3 = vpop.f32.mrf.mxu0  ;;  %v4023_v4 = vpop.f32.mrf.mxu1 }
 0x132   :  { %v4906_v5 = vpop.f32.mrf.mxu0  ;;  %v4908_v6 = vpop.f32.mrf.mxu1 }
 0x133   :  { %v1665_v7 = vsel %vm111_vm0, %v4908_v6, -inf  ;;  %v1662_v8 = vsel %vm111_vm0, %v4906_v5, -inf }
 0x134   :  { %v4034_v9 = vpop.f32.mrf.mxu1  ;;  %1666 = vmax.xlane.f32.xlu1 %v1665_v7  ;;  %1663 = vmax.xlane.f32.xlu0 %v1662_v8  ;;  %v4028_v12 = vpop.f32.mrf.mxu0 }
 0x136   :  { %v1351_v15 = vpop.f32.mrf.mxu0  ;;  %v1397_v16 = vpop.f32.mrf.mxu1 }
 0x138   :  { %v4029_v17 = vpop.f32.mrf.mxu0  ;;  %v4035_v18 = vpop.f32.mrf.mxu1 }
 0x13a   :  { %v4914_v19 = vpop.f32.mrf.mxu0  ;;  %v4916_v20 = vpop.f32.mrf.mxu1 }
 0x13b   :  { %v1671_v21 = vsel %vm111_vm0, %v4916_v20, -inf  ;;  %v1668_v24 = vsel %vm111_vm0, %v4914_v19, -inf }
 0x13c   :  { %v4046_v27 = vpop.f32.mrf.mxu1  ;;  %1672 = vmax.xlane.f32.xlu1 %v1671_v21  ;;  %1669 = vmax.xlane.f32.xlu0 %v1668_v24  ;;  %v4040_v28 = vpop.f32.mrf.mxu0 }
 0x13d   :  { %v81_v28 = vld [vmem:[%s5431_s2 + $0x8] sm:$0xf] }
 0x13e   :  { %v1443_v29 = vpop.f32.mrf.mxu0  ;;  %v1489_v30 = vpop.f32.mrf.mxu1 }
 0x13f   :  { %v2097_v30 = vsel %vm2003_vm2, %v81_v28, 0  ;;  %v86_v28 = vld [vmem:[%s5431_s2 + $0x1c] sm:$0xf] }
 0x140   :  { %v4041_v31 = vpop.f32.mrf.mxu0  ;;  %v4047_v32 = vpop.f32.mrf.mxu1 }
 0x142   :  { %v4922_v33 = vpop.f32.mrf.mxu0  ;;  %v4924_v40 = vpop.f32.mrf.mxu1 }
 0x143   :  { %v1677_v41 = vsel %vm111_vm0, %v4924_v40, -inf  ;;  %v1674_v42 = vsel %vm111_vm0, %v4922_v33, -inf }
 0x144   :  { %v4058_v43 = vpop.f32.mrf.mxu1  ;;  %1678 = vmax.xlane.f32.xlu1 %v1677_v41  ;;  %1675 = vmax.xlane.f32.xlu0 %v1674_v42  ;;  %v4052_v46 = vpop.f32.mrf.mxu0  ;;  %v82_v41 = vld [vmem:[%s5431_s2 + $0xc] sm:$0xf] }
 0x145   :  { %v2143_v42 = vsel %vm2003_vm2, %v82_v41, 0 }
 0x146   :  { %v1535_v47 = vpop.f32.mrf.mxu0  ;;  %v1581_v48 = vpop.f32.mrf.mxu1 }
 0x147   :  { %v83_v48 = vld [vmem:[%s5431_s2 + $0x10] sm:$0xf] }
 0x148   :  { %v4053_v51 = vpop.f32.mrf.mxu0  ;;  %v4059_v56 = vpop.f32.mrf.mxu1 }
 0x155   :  { %v1586_v57 = vpop.xlane.xlu0 %1585 }
 0x156   :  { %v1680_v58 = vsub.f32 %v4792_v34, %v1586_v57 }
 0x158   :  { %v1712_v59 = vpack.c.bf16 %v1680_v58, %v1680_v58 }
 0x159   :  { %v1589_v60 = vpop.xlane.xlu0 %1588 }
 0x15a   :  { %v1745_v63 = vmul.bf16 1069105081, %v1712_v59  ;;  %v1681_v3 = vsub.f32 %v4794_v35, %v1589_v60  ;;  %v2189_v59 = vsel %vm2003_vm2, %v83_v48, 0 }
 0x15c   :  { %4269 = vpow.bf16 %v1745_v63  ;;  %v1713_v4 = vpack.c.bf16 %v1681_v3, %v1681_v3  ;;  %v84_v63 = vld [vmem:[%s5431_s2 + $0x14] sm:$0xf] }
 0x15d   :  { %v1592_v7 = vpop.xlane.xlu1 %1591 }
 0x15e   :  { %v1748_v8 = vmul.bf16 1069105081, %v1713_v4  ;;  %v1682_v9 = vsub.f32 %v4800_v44, %v1592_v7 }
 0x160   :  { %4271 = vpow.bf16 %v1748_v8  ;;  %v1714_v12 = vpack.c.bf16 %v1682_v9, %v1682_v9  ;;  %v2235_v9 = vsel %vm2003_vm2, %v84_v63, 0 }
 0x161   :  { %v1595_v15 = vpop.xlane.xlu1 %1594 }
 0x162   :  { %v1751_v16 = vmul.bf16 1069105081, %v1714_v12  ;;  %v1683_v17 = vsub.f32 %v4802_v45, %v1595_v15 }
 0x164   :  { %4273 = vpow.bf16 %v1751_v16  ;;  %v1715_v18 = vpack.c.bf16 %v1683_v17, %v1683_v17  ;;  %v85_v17 = vld [vmem:[%s5431_s2 + $0x18] sm:$0xf] }
 0x165   :  { %v1601_v34 = vpop.xlane.xlu1 %1600  ;;  %v1598_v21 = vpop.xlane.xlu0 %1597 }
 0x166   :  { %v1754_v24 = vmul.bf16 1069105081, %v1715_v18  ;;  %v1685_v27 = vsub.f32 %v4810_v55, %v1601_v34  ;;  %v1684_v35 = vsub.f32 %v4808_v54, %v1598_v21 }
 0x168   :  { %4275 = vpow.bf16 %v1754_v24  ;;  %v1717_v44 = vpack.c.bf16 %v1685_v27, %v1685_v27  ;;  %v1716_v29 = vpack.c.bf16 %v1684_v35, %v1684_v35 }
 0x16a   :  { %v4940_v31 = vpop.eup %4269  ;;  %v1760_v45 = vmul.bf16 1069105081, %v1717_v44  ;;  %v1757_v32 = vmul.bf16 1069105081, %v1716_v29 }
 0x16b   :  { %4063 = vmatmul.mubr.msk.bf16.vlgmr.msra.gmra.mxu0 %vm111_vm0, %v4940_v31 }
 0x16c   :  { %4277 = vpow.bf16 %v1760_v45  ;;  %4073 = vmatpush3.bf16.msra.mxu0 %v2097_v30  ;;  %4074 = vmatprep.mubr.msk.bf16.mxu0 %vm4398_vm1, %v4397_v0 }
 0x16d   :  { %4279 = vpow.bf16 %v1757_v32  ;;  %v1607_v54 = vpop.xlane.xlu1 %1606  ;;  %v1604_v55 = vpop.xlane.xlu0 %1603  ;;  %4084 = vmatprep.subr.bf16.mxu0 %v4397_v0  ;;  %v2327_v32 = vsel %vm2003_vm2, %v86_v28, 0 }
 0x16e   :  { %v4272_v43 = vpop.eup %4271  ;;  %v1687_v46 = vsub.f32 %v4818_v2, %v1607_v54  ;;  %v1686_v47 = vsub.f32 %v4816_v1, %v1604_v55 }
 0x16f   :  { %4069 = vmatmul.mubr.msk.bf16.vlgmr.msra.gmra.mxu1 %vm111_vm0, %v4272_v43  ;;  %v1841_v51 = vunpack.c.l.bf16 %v4272_v43  ;;  %v87_v43 = vld [vmem:[%s5431_s2 + $0x20] sm:$0xf] }
 0x170   :  { %v1719_v56 = vpack.c.bf16 %v1687_v46, %v1687_v46  ;;  %v1718_v57 = vpack.c.bf16 %v1686_v47, %v1686_v47  ;;  %4079 = vmatpush3.bf16.msra.mxu1 %v2143_v42  ;;  %4080 = vmatprep.mubr.msk.bf16.mxu1 %vm4398_vm1, %v4397_v0 }
 0x171   :  { %v1875_v58 = vsel %vm111_vm0, %v1841_v51, 0.0  ;;  %4090 = vmatprep.subr.bf16.mxu1 %v4397_v0 }
 0x172   :  { %v4274_v1 = vpop.eup %4273  ;;  %v1766_v2 = vmul.bf16 1069105081, %v1719_v56  ;;  %v1763_v60 = vmul.bf16 1069105081, %v1718_v57  ;;  %1876 = vadd.xlane.f32.xlu0 %v1875_v58  ;;  %v2373_v57 = vsel %vm2003_vm2, %v87_v43, 0 }
 0x173   :  { %4075 = vmatmul.mubr.msk.bf16.vlgmr.msra.gmra.mxu0 %vm111_vm0, %v4274_v1  ;;  %v1842_v3 = vunpack.c.l.bf16 %v4274_v1 }
 0x174   :  { %4281 = vpow.bf16 %v1766_v2  ;;  %4085 = vmatpush3.bf16.msra.mxu0 %v2189_v59  ;;  %4086 = vmatprep.mubr.msk.bf16.mxu0 %vm4398_vm1, %v4397_v0 }
 0x175   :  { %4283 = vpow.bf16 %v1763_v60  ;;  %v1613_v4 = vpop.xlane.xlu1 %1612  ;;  %v1610_v7 = vpop.xlane.xlu0 %1609  ;;  %v1878_v8 = vsel %vm111_vm0, %v1842_v3, 0.0  ;;  %4096 = vmatprep.subr.bf16.mxu0 %v4397_v0 }
 0x176   :  { %v4276_v12 = vpop.eup %4275  ;;  %v1689_v15 = vsub.f32 %v4831_v14, %v1613_v4  ;;  %v1688_v16 = vsub.f32 %v4829_v13, %v1610_v7  ;;  %1879 = vadd.xlane.f32.xlu0 %v1878_v8  ;;  %v2281_v14 = vsel %vm2003_vm2, %v85_v17, 0  ;;  %v89_v8 = vld [vmem:[%s5431_s2 + $0x28] sm:$0xf] }
 0x177   :  { %4081 = vmatmul.mubr.msk.bf16.vlgmr.msra.gmra.mxu1 %vm111_vm0, %v4276_v12  ;;  %v1843_v18 = vunpack.c.l.bf16 %v4276_v12 }
 0x178   :  { %v1721_v34 = vpack.c.bf16 %v1689_v15, %v1689_v15  ;;  %v1720_v21 = vpack.c.bf16 %v1688_v16, %v1688_v16  ;;  %4091 = vmatpush3.bf16.msra.mxu1 %v2235_v9  ;;  %4092 = vmatprep.mubr.msk.bf16.mxu1 %vm4398_vm1, %v4397_v0 }
 0x179   :  { %v1881_v24 = vsel %vm111_vm0, %v1843_v18, 0.0  ;;  %4102 = vmatprep.subr.bf16.mxu1 %v4397_v0  ;;  %v2465_v18 = vsel %vm2003_vm2, %v89_v8, 0 }
 0x17a   :  { %v4278_v13 = vpop.eup %4277  ;;  %v1772_v27 = vmul.bf16 1069105081, %v1721_v34  ;;  %v1769_v35 = vmul.bf16 1069105081, %v1720_v21  ;;  %1882 = vadd.xlane.f32.xlu0 %v1881_v24 }
 0x17b   :  { %v4280_v44 = vpop.eup %4279  ;;  %v1845_v42 = vunpack.c.l.bf16 %v4278_v13 }
 0x17c   :  { %4285 = vpow.bf16 %v1772_v27  ;;  %4087 = vmatmul.mubr.msk.bf16.vlgmr.msra.gmra.mxu0 %vm111_vm0, %v4280_v44  ;;  %v1844_v29 = vunpack.c.l.bf16 %v4280_v44 }
 0x17d   :  { %4287 = vpow.bf16 %v1769_v35  ;;  %4097 = vmatpush3.bf16.msra.mxu0 %v2281_v14  ;;  %v1619_v30 = vpop.xlane.xlu1 %1618  ;;  %v1616_v45 = vpop.xlane.xlu0 %1615  ;;  %4098 = vmatprep.mubr.msk.bf16.mxu0 %vm4398_vm1, %v4397_v0  ;;  %v1887_v56 = vsel %vm111_vm0, %v1845_v42, 0.0 }
 0x17e   :  { %v1691_v41 = vsub.f32 %v4844_v26, %v1619_v30  ;;  %v1690_v54 = vsub.f32 %v4842_v25, %v1616_v45  ;;  %v1884_v55 = vsel %vm111_vm0, %v1844_v29, 0.0  ;;  %4108 = vmatprep.subr.bf16.mxu0 %v4397_v0  ;;  %v88_v25 = vld [vmem:[%s5431_s2 + $0x24] sm:$0xf]  ;;  %v91_v29 = vld [vmem:[%s5431_s2 + $0x30] sm:$0xf] }
 0x17f   :  { %1885 = vadd.xlane.f32.xlu0 %v1884_v55  ;;  %4093 = vmatmul.mubr.msk.bf16.vlgmr.msra.gmra.mxu1 %vm111_vm0, %v4278_v13  ;;  %v2419_v60 = vsel %vm2003_vm2, %v88_v25, 0  ;;  %v2557_v55 = vsel %vm2003_vm2, %v91_v29, 0 }
 0x180   :  { %v1723_v46 = vpack.c.bf16 %v1691_v41, %v1691_v41  ;;  %v1722_v47 = vpack.c.bf16 %v1690_v54, %v1690_v54  ;;  %4103 = vmatpush3.bf16.msra.mxu1 %v2327_v32  ;;  %4104 = vmatprep.mubr.msk.bf16.mxu1 %vm4398_vm1, %v4397_v0 }
 0x181   :  { %4114 = vmatprep.subr.bf16.mxu1 %v4397_v0 }
 0x182   :  { %v4282_v26 = vpop.eup %4281  ;;  %v1778_v48 = vmul.bf16 1069105081, %v1723_v46  ;;  %v1775_v51 = vmul.bf16 1069105081, %v1722_v47 }
 0x183   :  { %v4284_v58 = vpop.eup %4283  ;;  %1888 = vadd.xlane.f32.xlu0 %v1887_v56  ;;  %v1847_v7 = vunpack.c.l.bf16 %v4282_v26 }
 0x184   :  { %4289 = vpow.bf16 %v1778_v48  ;;  %4099 = vmatmul.mubr.msk.bf16.vlgmr.msra.gmra.mxu0 %vm111_vm0, %v4284_v58  ;;  %v1846_v59 = vunpack.c.l.bf16 %v4284_v58 }
 0x185   :  { %4291 = vpow.bf16 %v1775_v51  ;;  %4109 = vmatpush3.bf16.msra.mxu0 %v2373_v57  ;;  %v1625_v1 = vpop.xlane.xlu1 %1624  ;;  %v1622_v2 = vpop.xlane.xlu0 %1621  ;;  %4110 = vmatprep.mubr.msk.bf16.mxu0 %vm4398_vm1, %v4397_v0  ;;  %v1893_v17 = vsel %vm111_vm0, %v1847_v7, 0.0  ;;  %v93_v57 = vld [vmem:[%s5431_s2 + $0x38] sm:$0xf] }
 0x186   :  { %v1693_v63 = vsub.f32 %v4852_v38, %v1625_v1  ;;  %v1692_v3 = vsub.f32 %v4850_v37, %v1622_v2  ;;  %v1890_v4 = vsel %vm111_vm0, %v1846_v59, 0.0  ;;  %4120 = vmatprep.subr.bf16.mxu0 %v4397_v0  ;;  %v90_v37 = vld [vmem:[%s5431_s2 + $0x2c] sm:$0xf] }
 0x187   :  { %1891 = vadd.xlane.f32.xlu0 %v1890_v4  ;;  %4105 = vmatmul.mubr.msk.bf16.vlgmr.msra.gmra.mxu1 %vm111_vm0, %v4282_v26  ;;  %v2511_v13 = vsel %vm2003_vm2, %v90_v37, 0 }
 0x188   :  { %v1725_v9 = vpack.c.bf16 %v1693_v63, %v1693_v63  ;;  %v1724_v12 = vpack.c.bf16 %v1692_v3, %v1692_v3  ;;  %4115 = vmatpush3.bf16.msra.mxu1 %v2419_v60  ;;  %4116 = vmatprep.mubr.msk.bf16.mxu1 %vm4398_vm1, %v4397_v0  ;;  %v2649_v63 = vsel %vm2003_vm2, %v93_v57, 0 }
 0x189   :  { %4126 = vmatprep.subr.bf16.mxu1 %v4397_v0 }
 0x18a   :  { %v4286_v38 = vpop.eup %4285  ;;  %v1784_v15 = vmul.bf16 1069105081, %v1725_v9  ;;  %v1781_v16 = vmul.bf16 1069105081, %v1724_v12 }
 0x18b   :  { %v4288_v34 = vpop.eup %4287  ;;  %1894 = vadd.xlane.f32.xlu0 %v1893_v17  ;;  %v1849_v44 = vunpack.c.l.bf16 %v4286_v38 }
 0x18c   :  { %4293 = vpow.bf16 %v1784_v15  ;;  %4111 = vmatmul.mubr.msk.bf16.vlgmr.msra.gmra.mxu0 %vm111_vm0, %v4288_v34  ;;  %v1848_v21 = vunpack.c.l.bf16 %v4288_v34 }
 0x18d   :  { %4295 = vpow.bf16 %v1781_v16  ;;  %4121 = vmatpush3.bf16.msra.mxu0 %v2465_v18  ;;  %v1631_v24 = vpop.xlane.xlu1 %1630  ;;  %v1628_v14 = vpop.xlane.xlu0 %1627  ;;  %4122 = vmatprep.mubr.msk.bf16.mxu0 %vm4398_vm1, %v4397_v0  ;;  %v1899_v54 = vsel %vm111_vm0, %v1849_v44, 0.0  ;;  %v95_v16 = vld [vmem:[%s5431_s2 + $0x40] sm:$0xf] }
 0x18e   :  { %v1695_v27 = vsub.f32 %v4860_v50, %v1631_v24  ;;  %v1694_v35 = vsub.f32 %v4858_v49, %v1628_v14  ;;  %v1896_v28 = vsel %vm111_vm0, %v1848_v21, 0.0  ;;  %4132 = vmatprep.subr.bf16.mxu0 %v4397_v0  ;;  %v92_v49 = vld [vmem:[%s5431_s2 + $0x34] sm:$0xf]  ;;  %v2741_v14 = vsel %vm2003_vm2, %v95_v16, 0 }
 0x18f   :  { %1897 = vadd.xlane.f32.xlu0 %v1896_v28  ;;  %4117 = vmatmul.mubr.msk.bf16.vlgmr.msra.gmra.mxu1 %vm111_vm0, %v4286_v38  ;;  %v2603_v25 = vsel %vm2003_vm2, %v92_v49, 0 }
 0x190   :  { %v1727_v30 = vpack.c.bf16 %v1695_v27, %v1695_v27  ;;  %v1726_v45 = vpack.c.bf16 %v1694_v35, %v1694_v35  ;;  %4127 = vmatpush3.bf16.msra.mxu1 %v2511_v13  ;;  %4128 = vmatprep.mubr.msk.bf16.mxu1 %vm4398_vm1, %v4397_v0 }
 0x191   :  { %4138 = vmatprep.subr.bf16.mxu1 %v4397_v0 }
 0x192   :  { %v4290_v50 = vpop.eup %4289  ;;  %v1790_v32 = vmul.bf16 1069105081, %v1727_v30  ;;  %v1787_v41 = vmul.bf16 1069105081, %v1726_v45 }
 0x193   :  { %v4292_v42 = vpop.eup %4291  ;;  %1900 = vadd.xlane.f32.xlu0 %v1899_v54  ;;  %v1851_v56 = vunpack.c.l.bf16 %v4290_v50 }
 0x194   :  { %4297 = vpow.bf16 %v1790_v32  ;;  %4123 = vmatmul.mubr.msk.bf16.vlgmr.msra.gmra.mxu0 %vm111_vm0, %v4292_v42  ;;  %v1850_v43 = vunpack.c.l.bf16 %v4292_v42 }
 0x195   :  { %4299 = vpow.bf16 %v1787_v41  ;;  %4133 = vmatpush3.bf16.msra.mxu0 %v2557_v55  ;;  %v1637_v46 = vpop.xlane.xlu1 %1636  ;;  %v1634_v47 = vpop.xlane.xlu0 %1633  ;;  %4134 = vmatprep.mubr.msk.bf16.mxu0 %vm4398_vm1, %v4397_v0  ;;  %v1905_v60 = vsel %vm111_vm0, %v1851_v56, 0.0 }
 0x196   :  { %v1697_v26 = vsub.f32 %v4868_v62, %v1637_v46  ;;  %v1696_v48 = vsub.f32 %v4866_v61, %v1634_v47  ;;  %v1902_v51 = vsel %vm111_vm0, %v1850_v43, 0.0  ;;  %4144 = vmatprep.subr.bf16.mxu0 %v4397_v0  ;;  %v94_v61 = vld [vmem:[%s5431_s2 + $0x3c] sm:$0xf]  ;;  %v1840_v46 = vunpack.c.l.bf16 %v4940_v31 }
 0x197   :  { %1903 = vadd.xlane.f32.xlu0 %v1902_v51  ;;  %4129 = vmatmul.mubr.msk.bf16.vlgmr.msra.gmra.mxu1 %vm111_vm0, %v4290_v50  ;;  %v2695_v9 = vsel %vm2003_vm2, %v94_v61, 0  ;;  %v97_v50 = vld [vmem:[%s5431_s2 + $0x48] sm:$0xf]  ;;  %v99_v61 = vld [vmem:[%s5431_s2 + $0x50] sm:$0xf] }
 0x198   :  { %v1729_v58 = vpack.c.bf16 %v1697_v26, %v1697_v26  ;;  %v1728_v59 = vpack.c.bf16 %v1696_v48, %v1696_v48  ;;  %4139 = vmatpush3.bf16.msra.mxu1 %v2603_v25  ;;  %4140 = vmatprep.mubr.msk.bf16.mxu1 %vm4398_vm1, %v4397_v0 }
 0x199   :  { %4150 = vmatprep.subr.bf16.mxu1 %v4397_v0 }
 0x19a   :  { %v4294_v62 = vpop.eup %4293  ;;  %v1796_v1 = vmul.bf16 1069105081, %v1729_v58  ;;  %v1793_v2 = vmul.bf16 1069105081, %v1728_v59  ;;  %v1872_v59 = vsel %vm111_vm0, %v1840_v46, 0.0 }
 0x19b   :  { %v4296_v3 = vpop.eup %4295  ;;  %1906 = vadd.xlane.f32.xlu0 %v1905_v60  ;;  %v1853_v15 = vunpack.c.l.bf16 %v4294_v62 }
 0x19c   :  { %4301 = vpow.bf16 %v1796_v1  ;;  %4135 = vmatmul.mubr.msk.bf16.vlgmr.msra.gmra.mxu0 %vm111_vm0, %v4296_v3  ;;  %v1852_v4 = vunpack.c.l.bf16 %v4296_v3  ;;  %v100_v3 = vld [vmem:[%s5431_s2 + $0x54] sm:$0xf] }
 0x19d   :  { %4303 = vpow.bf16 %v1793_v2  ;;  %4145 = vmatpush3.bf16.msra.mxu0 %v2649_v63  ;;  %v1643_v7 = vpop.xlane.xlu1 %1642  ;;  %v1640_v8 = vpop.xlane.xlu0 %1639  ;;  %4146 = vmatprep.mubr.msk.bf16.mxu0 %vm4398_vm1, %v4397_v0  ;;  %v1911_v24 = vsel %vm111_vm0, %v1853_v15, 0.0 }
 0x19e   :  { %v1699_v12 = vsub.f32 %v4876_v11, %v1643_v7  ;;  %v1698_v37 = vsub.f32 %v4874_v10, %v1640_v8  ;;  %v1908_v38 = vsel %vm111_vm0, %v1852_v4, 0.0  ;;  %4156 = vmatprep.subr.bf16.mxu0 %v4397_v0  ;;  %v96_v10 = vld [vmem:[%s5431_s2 + $0x44] sm:$0xf] }
 0x19f   :  { %1909 = vadd.xlane.f32.xlu0 %v1908_v38  ;;  %4141 = vmatmul.mubr.msk.bf16.vlgmr.msra.gmra.mxu1 %vm111_vm0, %v4294_v62  ;;  %v2787_v44 = vsel %vm2003_vm2, %v96_v10, 0 }
 0x1a0   :  { %v1731_v17 = vpack.c.bf16 %v1699_v12, %v1699_v12  ;;  %v1730_v18 = vpack.c.bf16 %v1698_v37, %v1698_v37  ;;  %4151 = vmatpush3.bf16.msra.mxu1 %v2695_v9  ;;  %4152 = vmatprep.mubr.msk.bf16.mxu1 %vm4398_vm1, %v4397_v0  ;;  %v2971_v12 = vsel %vm2003_vm2, %v100_v3, 0 }
 0x1a1   :  { %4162 = vmatprep.subr.bf16.mxu1 %v4397_v0 }
 0x1a2   :  { %v4298_v11 = vpop.eup %4297  ;;  %v1802_v34 = vmul.bf16 1069105081, %v1731_v17  ;;  %v1799_v21 = vmul.bf16 1069105081, %v1730_v18  ;;  %v101_v17 = vld [vmem:[%s5431_s2 + $0x58] sm:$0xf] }
 0x1a3   :  { %v4300_v13 = vpop.eup %4299  ;;  %1912 = vadd.xlane.f32.xlu0 %v1911_v24  ;;  %v1855_v49 = vunpack.c.l.bf16 %v4298_v11  ;;  %v3017_v24 = vsel %vm2003_vm2, %v101_v17, 0 }
 0x1a4   :  { %4305 = vpow.bf16 %v1802_v34  ;;  %4147 = vmatmul.mubr.msk.bf16.vlgmr.msra.gmra.mxu0 %vm111_vm0, %v4300_v13  ;;  %v1854_v27 = vunpack.c.l.bf16 %v4300_v13 }
 0x1a5   :  { %4307 = vpow.bf16 %v1799_v21  ;;  %4157 = vmatpush3.bf16.msra.mxu0 %v2741_v14  ;;  %v1649_v35 = vpop.xlane.xlu1 %1648  ;;  %v1646_v28 = vpop.xlane.xlu0 %1645  ;;  %4158 = vmatprep.mubr.msk.bf16.mxu0 %vm4398_vm1, %v4397_v0  ;;  %v1917_v43 = vsel %vm111_vm0, %v1855_v49, 0.0  ;;  %v103_v49 = vld [vmem:[%s5431_s2 + $0x60] sm:$0xf] }
 0x1a6   :  { %v1701_v29 = vsub.f32 %v4884_v23, %v1649_v35  ;;  %v1700_v30 = vsub.f32 %v4882_v22, %v1646_v28  ;;  %v1914_v45 = vsel %vm111_vm0, %v1854_v27, 0.0  ;;  %4168 = vmatprep.subr.bf16.mxu0 %v4397_v0  ;;  %v2833_v22 = vsel %vm2003_vm2, %v97_v50, 0  ;;  %v98_v23 = vld [vmem:[%s5431_s2 + $0x4c] sm:$0xf] }
 0x1a7   :  { %1915 = vadd.xlane.f32.xlu0 %v1914_v45  ;;  %4153 = vmatmul.mubr.msk.bf16.vlgmr.msra.gmra.mxu1 %vm111_vm0, %v4298_v11  ;;  %v2879_v56 = vsel %vm2003_vm2, %v98_v23, 0 }
 0x1a8   :  { %v1733_v32 = vpack.c.bf16 %v1701_v29, %v1701_v29  ;;  %v1732_v41 = vpack.c.bf16 %v1700_v30, %v1700_v30  ;;  %4163 = vmatpush3.bf16.msra.mxu1 %v2787_v44  ;;  %4164 = vmatprep.mubr.msk.bf16.mxu1 %vm4398_vm1, %v4397_v0 }
 0x1a9   :  { %4174 = vmatprep.subr.bf16.mxu1 %v4397_v0 }
 0x1aa   :  { %v4302_v54 = vpop.eup %4301  ;;  %v1808_v55 = vmul.bf16 1069105081, %v1733_v32  ;;  %v1805_v42 = vmul.bf16 1069105081, %v1732_v41 }
 0x1ab   :  { %v4304_v47 = vpop.eup %4303  ;;  %1918 = vadd.xlane.f32.xlu0 %v1917_v43  ;;  %v1857_v25 = vunpack.c.l.bf16 %v4302_v54 }
 0x1ac   :  { %4309 = vpow.bf16 %v1808_v55  ;;  %4159 = vmatmul.mubr.msk.bf16.vlgmr.msra.gmra.mxu0 %vm111_vm0, %v4304_v47  ;;  %v1856_v57 = vunpack.c.l.bf16 %v4304_v47 }
 0x1ad   :  { %4311 = vpow.bf16 %v1805_v42  ;;  %4169 = vmatpush3.bf16.msra.mxu0 %v2833_v22  ;;  %v1655_v26 = vpop.xlane.xlu1 %1654  ;;  %v1652_v48 = vpop.xlane.xlu0 %1651  ;;  %v1923_v51 = vsel %vm111_vm0, %v1857_v25, 0.0  ;;  %4170 = vmatprep.mubr.msk.bf16.mxu0 %vm4398_vm1, %v4397_v0 }
 0x1ae   :  { %v1703_v31 = vsub.f32 %v4892_v39, %v1655_v26  ;;  %v1702_v58 = vsub.f32 %v4890_v36, %v1652_v48  ;;  %1924 = vadd.xlane.f32.xlu1 %v1923_v51  ;;  %4180 = vmatprep.subr.bf16.mxu0 %v4397_v0  ;;  %v1920_v36 = vsel %vm111_vm0, %v1856_v57, 0.0  ;;  %v2925_v39 = vsel %vm2003_vm2, %v99_v61, 0 }
 0x1af   :  { %1873 = vadd.xlane.f32.xlu0 %v1872_v59  ;;  %4165 = vmatmul.mubr.msk.bf16.vlgmr.msra.gmra.mxu1 %vm111_vm0, %v4302_v54  ;;  %v3109_v54 = vsel %vm2003_vm2, %v103_v49, 0 }
 0x1b0   :  { %v1735_v62 = vpack.c.bf16 %v1703_v31, %v1703_v31  ;;  %v1734_v1 = vpack.c.bf16 %v1702_v58, %v1702_v58  ;;  %4175 = vmatpush3.bf16.msra.mxu1 %v2879_v56  ;;  %4176 = vmatprep.mubr.msk.bf16.mxu1 %vm4398_vm1, %v4397_v0  ;;  %v105_v56 = vld [vmem:[%s5431_s2 + $0x68] sm:$0xf] }
 0x1b1   :  { %4186 = vmatprep.subr.bf16.mxu1 %v4397_v0 }
 0x1b2   :  { %v4306_v2 = vpop.eup %4305  ;;  %v1814_v60 = vmul.bf16 1069105081, %v1735_v62  ;;  %v1811_v63 = vmul.bf16 1069105081, %v1734_v1  ;;  %1921 = vadd.xlane.f32.xlu1 %v1920_v36  ;;  %v3201_v62 = vsel %vm2003_vm2, %v105_v56, 0 }
 0x1b3   :  { %v4308_v4 = vpop.eup %4307  ;;  %v1859_v16 = vunpack.c.l.bf16 %v4306_v2 }
 0x1b4   :  { %4313 = vpow.bf16 %v1814_v60  ;;  %4171 = vmatmul.mubr.msk.bf16.vlgmr.msra.gmra.mxu0 %vm111_vm0, %v4308_v4  ;;  %v1858_v7 = vunpack.c.l.bf16 %v4308_v4 }
 0x1b5   :  { %4315 = vpow.bf16 %v1811_v63  ;;  %4181 = vmatpush3.bf16.msra.mxu0 %v2925_v39  ;;  %v1661_v8 = vpop.xlane.xlu1 %1660  ;;  %v1658_v9 = vpop.xlane.xlu0 %1657  ;;  %4182 = vmatprep.mubr.msk.bf16.mxu0 %vm4398_vm1, %v4397_v0  ;;  %v1929_v21 = vsel %vm111_vm0, %v1859_v16, 0.0 }
 0x1b6   :  { %v1705_v37 = vsub.f32 %v4900_v53, %v1661_v8  ;;  %v1704_v38 = vsub.f32 %v4898_v52, %v1658_v9  ;;  %v1926_v15 = vsel %vm111_vm0, %v1858_v7, 0.0  ;;  %4192 = vmatprep.subr.bf16.mxu0 %v4397_v0  ;;  %v102_v52 = vld [vmem:[%s5431_s2 + $0x5c] sm:$0xf]  ;;  %v107_v8 = vld [vmem:[%s5431_s2 + $0x70] sm:$0xf] }
 0x1b7   :  { %1927 = vadd.xlane.f32.xlu1 %v1926_v15  ;;  %4177 = vmatmul.mubr.msk.bf16.vlgmr.msra.gmra.mxu1 %vm111_vm0, %v4306_v2  ;;  %v3063_v28 = vsel %vm2003_vm2, %v102_v52, 0  ;;  %v3293_v16 = vsel %vm2003_vm2, %v107_v8, 0 }
 0x1b8   :  { %v1737_v18 = vpack.c.bf16 %v1705_v37, %v1705_v37  ;;  %v1736_v10 = vpack.c.bf16 %v1704_v38, %v1704_v38  ;;  %4187 = vmatpush3.bf16.msra.mxu1 %v2971_v12  ;;  %4188 = vmatprep.mubr.msk.bf16.mxu1 %vm4398_vm1, %v4397_v0 }
 0x1b9   :  { %4198 = vmatprep.subr.bf16.mxu1 %v4397_v0 }
 0x1ba   :  { %v4310_v53 = vpop.eup %4309  ;;  %v1820_v11 = vmul.bf16 1069105081, %v1737_v18  ;;  %v1817_v34 = vmul.bf16 1069105081, %v1736_v10 }
 0x1bb   :  { %v4312_v14 = vpop.eup %4311  ;;  %1930 = vadd.xlane.f32.xlu1 %v1929_v21  ;;  %v1861_v45 = vunpack.c.l.bf16 %v4310_v53 }
 0x1bc   :  { %4317 = vpow.bf16 %v1820_v11  ;;  %4183 = vmatmul.mubr.msk.bf16.vlgmr.msra.gmra.mxu0 %vm111_vm0, %v4312_v14  ;;  %v1860_v13 = vunpack.c.l.bf16 %v4312_v14  ;;  %v109_v11 = vld [vmem:[%s5431_s2 + $0x78] sm:$0xf]  ;;  %v110_v14 = vld [vmem:[%s5431_s2 + $0x7c] sm:$0xf] }
 0x1bd   :  { %4319 = vpow.bf16 %v1817_v34  ;;  %4193 = vmatpush3.bf16.msra.mxu0 %v3017_v24  ;;  %v1667_v27 = vpop.xlane.xlu1 %1666  ;;  %v1664_v35 = vpop.xlane.xlu0 %1663  ;;  %4194 = vmatprep.mubr.msk.bf16.mxu0 %vm4398_vm1, %v4397_v0  ;;  %v1935_v23 = vsel %vm111_vm0, %v1861_v45, 0.0  ;;  %v3385_v24 = vsel %vm2003_vm2, %v109_v11, 0 }
 0x1be   :  { %v1707_v44 = vsub.f32 %v4908_v6, %v1667_v27  ;;  %v1706_v29 = vsub.f32 %v4906_v5, %v1664_v35  ;;  %v1932_v30 = vsel %vm111_vm0, %v1860_v13, 0.0  ;;  %4204 = vmatprep.subr.bf16.mxu0 %v4397_v0  ;;  %v104_v5 = vld [vmem:[%s5431_s2 + $0x64] sm:$0xf]  ;;  %v3431_v35 = vsel %vm2003_vm2, %v110_v14, 0 }
 0x1bf   :  { %1933 = vadd.xlane.f32.xlu1 %v1932_v30  ;;  %4189 = vmatmul.mubr.msk.bf16.vlgmr.msra.gmra.mxu1 %vm111_vm0, %v4310_v53  ;;  %v3155_v47 = vsel %vm2003_vm2, %v104_v5, 0 }
 0x1c0   :  { %v1739_v50 = vpack.c.bf16 %v1707_v44, %v1707_v44  ;;  %v1738_v32 = vpack.c.bf16 %v1706_v29, %v1706_v29  ;;  %4199 = vmatpush3.bf16.msra.mxu1 %v3063_v28  ;;  %4200 = vmatprep.mubr.msk.bf16.mxu1 %vm4398_vm1, %v4397_v0 }
 0x1c1   :  { %4210 = vmatprep.subr.bf16.mxu1 %v4397_v0 }
 0x1c2   :  { %v4314_v6 = vpop.eup %4313  ;;  %v1826_v41 = vmul.bf16 1069105081, %v1739_v50  ;;  %v1823_v22 = vmul.bf16 1069105081, %v1738_v32 }
 0x1c3   :  { %v4316_v55 = vpop.eup %4315  ;;  %1936 = vadd.xlane.f32.xlu1 %v1935_v23  ;;  %v1863_v51 = vunpack.c.l.bf16 %v4314_v6 }
 0x1c4   :  { %4321 = vpow.bf16 %v1826_v41  ;;  %4195 = vmatmul.mubr.msk.bf16.vlgmr.msra.gmra.mxu0 %vm111_vm0, %v4316_v55  ;;  %v1862_v42 = vunpack.c.l.bf16 %v4316_v55 }
 0x1c5   :  { %4323 = vpow.bf16 %v1823_v22  ;;  %4205 = vmatpush3.bf16.msra.mxu0 %v3109_v54  ;;  %v1673_v43 = vpop.xlane.xlu1 %1672  ;;  %v1670_v46 = vpop.xlane.xlu0 %1669  ;;  %4206 = vmatprep.mubr.msk.bf16.mxu0 %vm4398_vm1, %v4397_v0  ;;  %v1941_v61 = vsel %vm111_vm0, %v1863_v51, 0.0 }
 0x1c6   :  { %v1709_v25 = vsub.f32 %v4916_v20, %v1673_v43  ;;  %v1708_v26 = vsub.f32 %v4914_v19, %v1670_v46  ;;  %v1938_v48 = vsel %vm111_vm0, %v1862_v42, 0.0  ;;  %4216 = vmatprep.subr.bf16.mxu0 %v4397_v0  ;;  %v106_v19 = vld [vmem:[%s5431_s2 + $0x6c] sm:$0xf] }
 0x1c7   :  { %1939 = vadd.xlane.f32.xlu1 %v1938_v48  ;;  %4201 = vmatmul.mubr.msk.bf16.vlgmr.msra.gmra.mxu1 %vm111_vm0, %v4314_v6  ;;  %v3247_v60 = vsel %vm2003_vm2, %v106_v19, 0 }
 0x1c8   :  { %v1741_v57 = vpack.c.bf16 %v1709_v25, %v1709_v25  ;;  %v1740_v31 = vpack.c.bf16 %v1708_v26, %v1708_v26  ;;  %4211 = vmatpush3.bf16.msra.mxu1 %v3155_v47  ;;  %4212 = vmatprep.mubr.msk.bf16.mxu1 %vm4398_vm1, %v4397_v0 }
 0x1c9   :  { %4222 = vmatprep.subr.bf16.mxu1 %v4397_v0 }
 0x1ca   :  { %v4318_v20 = vpop.eup %4317  ;;  %v1832_v58 = vmul.bf16 1069105081, %v1741_v57  ;;  %v1829_v59 = vmul.bf16 1069105081, %v1740_v31 }
 0x1cb   :  { %v4320_v1 = vpop.eup %4319  ;;  %1942 = vadd.xlane.f32.xlu1 %v1941_v61  ;;  %v1865_v7 = vunpack.c.l.bf16 %v4318_v20 }
 0x1cc   :  { %4325 = vpow.bf16 %v1832_v58  ;;  %4207 = vmatmul.mubr.msk.bf16.vlgmr.msra.gmra.mxu0 %vm111_vm0, %v4320_v1  ;;  %v1864_v36 = vunpack.c.l.bf16 %v4320_v1 }
 0x1cd   :  { %4327 = vpow.bf16 %v1829_v59  ;;  %4217 = vmatpush3.bf16.msra.mxu0 %v3201_v62  ;;  %v1679_v39 = vpop.xlane.xlu1 %1678  ;;  %v1676_v2 = vpop.xlane.xlu0 %1675  ;;  %4218 = vmatprep.mubr.msk.bf16.mxu0 %vm4398_vm1, %v4397_v0  ;;  %v1947_v15 = vsel %vm111_vm0, %v1865_v7, 0.0 }
 0x1ce   :  { %v1711_v63 = vsub.f32 %v4924_v40, %v1679_v39  ;;  %v1710_v3 = vsub.f32 %v4922_v33, %v1676_v2  ;;  %v1944_v4 = vsel %vm111_vm0, %v1864_v36, 0.0  ;;  %4228 = vmatprep.subr.bf16.mxu0 %v4397_v0  ;;  %v108_v33 = vld [vmem:[%s5431_s2 + $0x74] sm:$0xf]  ;;  %s4399_s2 = smov 8  }
 0x1cf   :  { %1945 = vadd.xlane.f32.xlu1 %v1944_v4  ;;  %4213 = vmatmul.mubr.msk.bf16.vlgmr.msra.gmra.mxu1 %vm111_vm0, %v4318_v20  ;;  %v3339_v10 = vsel %vm2003_vm2, %v108_v33, 0 }
 0x1d0   :  { %v1743_v9 = vpack.c.bf16 %v1711_v63, %v1711_v63  ;;  %v1742_v12 = vpack.c.bf16 %v1710_v3, %v1710_v3  ;;  %4223 = vmatpush3.bf16.msra.mxu1 %v3247_v60  ;;  %4224 = vmatprep.mubr.msk.bf16.mxu1 %vm4398_vm1, %v4397_v0 }
 0x1d1   :  { %4234 = vmatprep.subr.bf16.mxu1 %v4397_v0 }
 0x1d2   :  { %v4322_v40 = vpop.eup %4321  ;;  %v1838_v37 = vmul.bf16 1069105081, %v1743_v9  ;;  %v1835_v38 = vmul.bf16 1069105081, %v1742_v12 }
 0x1d3   :  { %v4324_v17 = vpop.eup %4323  ;;  %1948 = vadd.xlane.f32.xlu1 %v1947_v15  ;;  %v1867_v53 = vunpack.c.l.bf16 %v4322_v40 }
 0x1d4   :  { %4329 = vpow.bf16 %v1838_v37  ;;  %4219 = vmatmul.mubr.msk.bf16.vlgmr.msra.gmra.mxu0 %vm111_vm0, %v4324_v17  ;;  %v1866_v18 = vunpack.c.l.bf16 %v4324_v17 }
 0x1d5   :  { %4331 = vpow.bf16 %v1835_v38  ;;  %4229 = vmatpush3.bf16.msra.mxu0 %v3293_v16  ;;  %4230 = vmatprep.mubr.msk.bf16.mxu0 %vm4398_vm1, %v4397_v0  ;;  %v1953_v21 = vsel %vm111_vm0, %v1867_v53, 0.0 }
 0x1d6   :  { %v1950_v52 = vsel %vm111_vm0, %v1866_v18, 0.0  ;;  %4240 = vmatprep.subr.bf16.mxu0 %v4397_v0 }
 0x1d7   :  { %1951 = vadd.xlane.f32.xlu1 %v1950_v52  ;;  %4225 = vmatmul.mubr.msk.bf16.vlgmr.msra.gmra.mxu1 %vm111_vm0, %v4322_v40 }
 0x1d8   :  { %4235 = vmatpush3.bf16.msra.mxu1 %v3339_v10  ;;  %4236 = vmatprep.mubr.msk.bf16.mxu1 %vm4398_vm1, %v4397_v0 }
 0x1d9   :  { %4246 = vmatprep.subr.bf16.mxu1 %v4397_v0 }
 0x1da   :  { %v4326_v34 = vpop.eup %4325 }
 0x1db   :  { %v4328_v13 = vpop.eup %4327  ;;  %1954 = vadd.xlane.f32.xlu1 %v1953_v21  ;;  %v1869_v44 = vunpack.c.l.bf16 %v4326_v34 }
 0x1dc   :  { %4231 = vmatmul.mubr.msk.bf16.vlgmr.msra.gmra.mxu0 %vm111_vm0, %v4328_v13  ;;  %v1868_v27 = vunpack.c.l.bf16 %v4328_v13 }
 0x1dd   :  { %4241 = vmatpush3.bf16.msra.mxu0 %v3385_v24  ;;  %4242 = vmatprep.mubr.msk.bf16.mxu0 %vm4398_vm1, %v4397_v0  ;;  %v1959_v30 = vsel %vm111_vm0, %v1869_v44, 0.0 }
 0x1de   :  { %v1956_v28 = vsel %vm111_vm0, %v1868_v27, 0.0 }
 0x1df   :  { %1957 = vadd.xlane.f32.xlu1 %v1956_v28  ;;  %4237 = vmatmul.mubr.msk.bf16.vlgmr.msra.gmra.mxu1 %vm111_vm0, %v4326_v34 }
 0x1e0   :  { %4247 = vmatpush3.bf16.msra.mxu1 %v3431_v35  ;;  %4248 = vmatprep.mubr.msk.bf16.mxu1 %vm4398_vm1, %v4397_v0  ;;  %vm3669_vm1 = vcmask 1048512  }
 0x1e2   :  { %v4330_v29 = vpop.eup %4329 }
 0x1e3   :  { %v4332_v45 = vpop.eup %4331  ;;  %1960 = vadd.xlane.f32.xlu1 %v1959_v30  ;;  %v1871_v32 = vunpack.c.l.bf16 %v4330_v29 }
 0x1e4   :  { %4243 = vmatmul.mubr.msk.bf16.vlgmr.msra.gmra.mxu0 %vm111_vm0, %v4332_v45  ;;  %v1870_v49 = vunpack.c.l.bf16 %v4332_v45 }
 0x1e5   :  { %v1965_v5 = vsel %vm111_vm0, %v1871_v32, 0.0 }
 0x1e6   :  { %v1962_v50 = vsel %vm111_vm0, %v1870_v49, 0.0 }
 0x1e7   :  { %1963 = vadd.xlane.f32.xlu1 %v1962_v50  ;;  %4249 = vmatmul.mubr.msk.bf16.vlgmr.msra.gmra.mxu1 %vm111_vm0, %v4330_v29 }
 0x1eb   :  { %1966 = vadd.xlane.f32.xlu1 %v1965_v5 }
 0x1fb   :  { %v1877_v6 = vpop.xlane.xlu0 %1876 }
 0x1fc   :  { %4333 = vrcp.f32 %v1877_v6 }
 0x1ff   :  { %v1880_v41 = vpop.xlane.xlu0 %1879 }
 0x200   :  { %4335 = vrcp.f32 %v1880_v41 }
 0x203   :  { %v1883_v0 = vpop.xlane.xlu0 %1882 }
 0x204   :  { %4337 = vrcp.f32 %v1883_v0 }
 0x208   :  { %v1886_v22 = vpop.xlane.xlu0 %1885 }
 0x209   :  { %v4334_v56 = vpop.eup %4333  ;;  %4339 = vrcp.f32 %v1886_v22 }
 0x20c   :  { %v1889_v23 = vpop.xlane.xlu0 %1888 }
 0x20d   :  { %4341 = vrcp.f32 %v1889_v23  ;;  %v4336_v61 = vpop.eup %4335 }
 0x210   :  { %v1892_v54 = vpop.xlane.xlu0 %1891 }
 0x211   :  { %v4338_v63 = vpop.eup %4337  ;;  %4343 = vrcp.f32 %v1892_v54 }
 0x214   :  { %v1895_v55 = vpop.xlane.xlu0 %1894 }
 0x216   :  { %v4340_v40 = vpop.eup %4339 }
 0x218   :  { %v1898_v42 = vpop.xlane.xlu0 %1897 }
 0x21a   :  { %v4342_v18 = vpop.eup %4341 }
 0x21c   :  { %v1901_v43 = vpop.xlane.xlu0 %1900 }
 0x21e   :  { %v4344_v14 = vpop.eup %4343 }
 0x220   :  { %v5238_v46 = vpop.xlane.xlu0 %1903 }
 0x224   :  { %v5240_v47 = vpop.xlane.xlu0 %1906 }
 0x228   :  { %v5242_v25 = vpop.xlane.xlu0 %1909 }
 0x22b   :  { %v5244_v26 = vpop.f32.mrf.mxu0 }
 0x22c   :  { %v5246_v48 = vpop.xlane.xlu0 %1912 }
 0x22d   :  { %v4064_v51 = vpop.f32.mrf.mxu0 }
 0x22f   :  { %v2087_v57 = vpop.f32.mrf.mxu1  ;;  %v2044_v31 = vpop.f32.mrf.mxu0 }
 0x230   :  { %v3474_v19 = vmul.f32 %v4334_v56, %v2087_v57  ;;  %v5248_v20 = vpop.xlane.xlu0 %1915 }
 0x231   :  { %v4065_v58 = vpop.f32.mrf.mxu0  ;;  %v4070_v59 = vpop.f32.mrf.mxu1 }
 0x232   :  { %3509 = vrot.lane.b32.xlu0 %v3474_v19, %s4399_s2 }
 0x233   :  { %v2090_v62 = vpop.f32.mrf.mxu1  ;;  %v2133_v1 = vpop.f32.mrf.mxu0 }
 0x234   :  { %v5251_v36 = vpop.xlane.xlu0 %1918  ;;  %v3475_v39 = vmul.f32 %v4336_v61, %v2133_v1 }
 0x235   :  { %v4071_v2 = vpop.f32.mrf.mxu1  ;;  %v4076_v60 = vpop.f32.mrf.mxu0 }
 0x236   :  { %3520 = vrot.lane.b32.xlu1 %v3475_v39, %s4400_s9 }
 0x237   :  { %v2179_v3 = vpop.f32.mrf.mxu1  ;;  %v2136_v8 = vpop.f32.mrf.mxu0 }
 0x238   :  { %v3476_v4 = vmul.f32 %v4338_v63, %v2179_v3  ;;  %v1874_v7 = vpop.xlane.xlu0 %1873  ;;  %v5255_v38 = vpop.xlane.xlu1 %1924 }
 0x239   :  { %4345 = vrcp.f32 %v1874_v7  ;;  %v4082_v9 = vpop.f32.mrf.mxu1  ;;  %v4077_v12 = vpop.f32.mrf.mxu0 }
 0x23a   :  { %4347 = vrcp.f32 %v1895_v55  ;;  %3531 = vrot.lane.b32.xlu0 %v3476_v4, %s4401_s10 }
 0x23b   :  { %v2182_v33 = vpop.f32.mrf.mxu1  ;;  %4349 = vrcp.f32 %v1898_v42 }
 0x23c   :  { %v2225_v37 = vpop.f32.mrf.mxu0  ;;  %4351 = vrcp.f32 %v1901_v43  ;;  %v5258_v21 = vpop.xlane.xlu1 %1921 }
 0x23d   :  { %v3477_v15 = vmul.f32 %v4340_v40, %v2225_v37  ;;  %v4083_v16 = vpop.f32.mrf.mxu1  ;;  %4353 = vrcp.f32 %v5238_v46 }
 0x23e   :  { %v4088_v17 = vpop.f32.mrf.mxu0  ;;  %4355 = vrcp.f32 %v5240_v47 }
 0x23f   :  { %3542 = vrot.lane.b32.xlu0 %v3477_v15, %s4402_s11  ;;  %v2271_v10 = vpop.f32.mrf.mxu1  ;;  %4357 = vrcp.f32 %v5242_v25 }
 0x240   :  { %v3478_v52 = vmul.f32 %v4342_v18, %v2271_v10  ;;  %v2228_v53 = vpop.f32.mrf.mxu0  ;;  %v5264_v32 = vpop.xlane.xlu1 %1927  ;;  %4359 = vrcp.f32 %v5246_v48 }
 0x241   :  { %v4094_v11 = vpop.f32.mrf.mxu1  ;;  %4361 = vrcp.f32 %v5248_v20 }
 0x242   :  { %v4089_v34 = vpop.f32.mrf.mxu0  ;;  %4363 = vrcp.f32 %v5251_v36 }
 0x243   :  { %3553 = vrot.lane.b32.xlu0 %v3478_v52, %s4403_s12  ;;  %v2274_v24 = vpop.f32.mrf.mxu1  ;;  %4365 = vrcp.f32 %v5258_v21 }
 0x244   :  { %v2317_v13 = vpop.f32.mrf.mxu0  ;;  %v5273_v43 = vpop.xlane.xlu1 %1930  ;;  %4367 = vrcp.f32 %v5255_v38 }
 0x245   :  { %v3479_v27 = vmul.f32 %v4344_v14, %v2317_v13  ;;  %v4095_v35 = vpop.f32.mrf.mxu1  ;;  %4369 = vrcp.f32 %v5264_v32 }
 0x246   :  { %v4346_v28 = vpop.eup %4345  ;;  %v4100_v44 = vpop.f32.mrf.mxu0  ;;  %4371 = vrcp.f32 %v5273_v43 }
 0x247   :  { %v4348_v29 = vpop.eup %4347  ;;  %3564 = vrot.lane.b32.xlu0 %v3479_v27, %s4404_s13  ;;  %v2363_v30 = vpop.f32.mrf.mxu1  ;;  %v3473_v45 = vmul.f32 %v4346_v28, %v5244_v26 }
 0x248   :  { %v3480_v49 = vmul.f32 %v4348_v29, %v2363_v30  ;;  %v2320_v50 = vpop.f32.mrf.mxu0  ;;  %v4350_v0 = vpop.eup %4349 }
 0x249   :  { %v4106_v5 = vpop.f32.mrf.mxu1  ;;  %3505 = vst.msk [vmem:[%s5432_s3] sm:$0xff] %vm111_vm0, %v3473_v45  ;;  %v4352_v42 = vpop.eup %4351 }
 0x24a   :  { %v4101_v6 = vpop.f32.mrf.mxu0  ;;  %v4354_v31 = vpop.eup %4353 }
 0x24b   :  { %3575 = vrot.lane.b32.xlu0 %v3480_v49, %s4405_s16  ;;  %v2366_v41 = vpop.f32.mrf.mxu1  ;;  %v1934_v58 = vpop.xlane.xlu1 %1933 }
 0x24c   :  { %v2409_v22 = vpop.f32.mrf.mxu0  ;;  %v4356_v62 = vpop.eup %4355  ;;  %4373 = vrcp.f32 %v1934_v58 }
 0x24d   :  { %v3481_v23 = vmul.f32 %v4350_v0, %v2409_v22  ;;  %v4107_v54 = vpop.f32.mrf.mxu1  ;;  %v4358_v4 = vpop.eup %4357 }
 0x24e   :  { %v4112_v55 = vpop.f32.mrf.mxu0  ;;  %v4360_v12 = vpop.eup %4359 }
 0x24f   :  { %3586 = vrot.lane.b32.xlu0 %v3481_v23, %s4406_s17  ;;  %v2455_v46 = vpop.f32.mrf.mxu1  ;;  %v1937_v63 = vpop.xlane.xlu1 %1936 }
 0x250   :  { %v3482_v47 = vmul.f32 %v4352_v42, %v2455_v46  ;;  %v2412_v26 = vpop.f32.mrf.mxu0  ;;  %v4362_v18 = vpop.eup %4361  ;;  %4375 = vrcp.f32 %v1937_v63 }
 0x251   :  { %v4118_v51 = vpop.f32.mrf.mxu1  ;;  %v4364_v34 = vpop.eup %4363 }
 0x252   :  { %v4113_v56 = vpop.f32.mrf.mxu0  ;;  %v4366_v28 = vpop.eup %4365 }
 0x253   :  { %3597 = vrot.lane.b32.xlu0 %v3482_v47, %s4407_s18  ;;  %v2458_v57 = vpop.f32.mrf.mxu1  ;;  %v1940_v37 = vpop.xlane.xlu1 %1939 }
 0x254   :  { %v2501_v19 = vpop.f32.mrf.mxu0  ;;  %v4368_v50 = vpop.eup %4367  ;;  %4377 = vrcp.f32 %v1940_v37 }
 0x255   :  { %v3483_v25 = vmul.f32 %v4354_v31, %v2501_v19  ;;  %v4119_v59 = vpop.f32.mrf.mxu1  ;;  %v4370_v54 = vpop.eup %4369 }
 0x256   :  { %v4124_v61 = vpop.f32.mrf.mxu0  ;;  %v4372_v47 = vpop.eup %4371 }
 0x257   :  { %3608 = vrot.lane.b32.xlu0 %v3483_v25, %s4408_s19  ;;  %v2547_v1 = vpop.f32.mrf.mxu1  ;;  %v1943_v21 = vpop.xlane.xlu1 %1942 }
 0x258   :  { %v3484_v39 = vmul.f32 %v4356_v62, %v2547_v1  ;;  %v2504_v48 = vpop.f32.mrf.mxu0  ;;  %4379 = vrcp.f32 %v1943_v21 }
 0x259   :  { %v4130_v2 = vpop.f32.mrf.mxu1  ;;  %v4374_v25 = vpop.eup %4373 }
 0x25a   :  { %v4125_v60 = vpop.f32.mrf.mxu0 }
 0x25b   :  { %3619 = vrot.lane.b32.xlu0 %v3484_v39, %s4409_s20  ;;  %v2550_v3 = vpop.f32.mrf.mxu1  ;;  %v1946_v29 = vpop.xlane.xlu1 %1945 }
 0x25c   :  { %v2593_v7 = vpop.f32.mrf.mxu0  ;;  %4381 = vrcp.f32 %v1946_v29 }
 0x25d   :  { %v3485_v8 = vmul.f32 %v4358_v4, %v2593_v7  ;;  %v4131_v9 = vpop.f32.mrf.mxu1  ;;  %v4376_v39 = vpop.eup %4375 }
 0x25e   :  { %v4136_v20 = vpop.f32.mrf.mxu0 }
 0x25f   :  { %3630 = vrot.lane.b32.xlu0 %v3485_v8, %s4410_s21  ;;  %v2639_v33 = vpop.f32.mrf.mxu1  ;;  %v1949_v22 = vpop.xlane.xlu1 %1948 }
 0x260   :  { %v3486_v40 = vmul.f32 %v4360_v12, %v2639_v33  ;;  %v2596_v36 = vpop.f32.mrf.mxu0  ;;  %4383 = vrcp.f32 %v1949_v22 }
 0x261   :  { %v4142_v15 = vpop.f32.mrf.mxu1  ;;  %v4378_v8 = vpop.eup %4377 }
 0x262   :  { %v4137_v16 = vpop.f32.mrf.mxu0 }
 0x263   :  { %3641 = vrot.lane.b32.xlu0 %v3486_v40, %s4411_s22  ;;  %v2642_v17 = vpop.f32.mrf.mxu1  ;;  %v1952_v57 = vpop.xlane.xlu1 %1951 }
 0x264   :  { %v2685_v10 = vpop.f32.mrf.mxu0  ;;  %4385 = vrcp.f32 %v1952_v57 }
 0x265   :  { %v3487_v52 = vmul.f32 %v4362_v18, %v2685_v10  ;;  %v4143_v53 = vpop.f32.mrf.mxu1  ;;  %v4380_v36 = vpop.eup %4379 }
 0x266   :  { %v4148_v11 = vpop.f32.mrf.mxu0 }
 0x267   :  { %3652 = vrot.lane.b32.xlu0 %v3487_v52, %s4412_s23  ;;  %v2731_v24 = vpop.f32.mrf.mxu1  ;;  %v1955_v48 = vpop.xlane.xlu1 %1954 }
 0x268   :  { %v3488_v14 = vmul.f32 %v4364_v34, %v2731_v24  ;;  %v2688_v38 = vpop.f32.mrf.mxu0  ;;  %4387 = vrcp.f32 %v1955_v48 }
 0x269   :  { %v4154_v13 = vpop.f32.mrf.mxu1  ;;  %v4382_v53 = vpop.eup %4381 }
 0x26a   :  { %v4149_v27 = vpop.f32.mrf.mxu0 }
 0x26b   :  { %3663 = vrot.lane.b32.xlu0 %v3488_v14, %s4413_s24  ;;  %v2734_v35 = vpop.f32.mrf.mxu1  ;;  %v1958_v20 = vpop.xlane.xlu1 %1957 }
 0x26c   :  { %v2777_v44 = vpop.f32.mrf.mxu0  ;;  %4389 = vrcp.f32 %v1958_v20 }
 0x26d   :  { %v3489_v30 = vmul.f32 %v4366_v28, %v2777_v44  ;;  %v4155_v45 = vpop.f32.mrf.mxu1  ;;  %v4384_v14 = vpop.eup %4383 }
 0x26e   :  { %v4160_v49 = vpop.f32.mrf.mxu0 }
 0x26f   :  { %3506 = vst.msk [vmem:[%s5432_s3 + $0x8] sm:$0xff] %vm111_vm0, %v3489_v30  ;;  %v2823_v32 = vpop.f32.mrf.mxu1  ;;  %v1961_v10 = vpop.xlane.xlu1 %1960  ;;  %vm3658_vm0 = vcmask 982912  }
 0x270   :  { %v3490_v5 = vmul.f32 %v4368_v50, %v2823_v32  ;;  %v2780_v6 = vpop.f32.mrf.mxu0  ;;  %4391 = vrcp.f32 %v1961_v10 }
 0x271   :  { %v4166_v41 = vpop.f32.mrf.mxu1  ;;  %v4386_v30 = vpop.eup %4385 }
 0x272   :  { %v4161_v0 = vpop.f32.mrf.mxu0  ;;  %3511 = vrot.lane.b32.xlu1 %v3490_v5, %s4399_s2 }
 0x273   :  { %v2826_v23 = vpop.f32.mrf.mxu1  ;;  %v1964_v35 = vpop.xlane.xlu1 %1963 }
 0x274   :  { %v2869_v55 = vpop.f32.mrf.mxu0  ;;  %4393 = vrcp.f32 %v1964_v35 }
 0x275   :  { %v3491_v42 = vmul.f32 %v4370_v54, %v2869_v55  ;;  %v4167_v43 = vpop.f32.mrf.mxu1  ;;  %v4388_v5 = vpop.eup %4387 }
 0x276   :  { %v4172_v46 = vpop.f32.mrf.mxu0 }
 0x277   :  { %3522 = vrot.lane.b32.xlu1 %v3491_v42, %s4400_s9  ;;  %v2915_v26 = vpop.f32.mrf.mxu1  ;;  %v1967_v6 = vpop.xlane.xlu1 %1966 }
 0x278   :  { %v2872_v51 = vpop.f32.mrf.mxu0  ;;  %v3492_v56 = vmul.f32 %v4372_v47, %v2915_v26  ;;  %4395 = vrcp.f32 %v1967_v6 }
 0x279   :  { %v4178_v31 = vpop.f32.mrf.mxu1  ;;  %v4390_v42 = vpop.eup %4389 }
 0x27a   :  { %v4173_v19 = vpop.f32.mrf.mxu0 }
 0x27b   :  { %3533 = vrot.lane.b32.xlu1 %v3492_v56, %s4401_s10  ;;  %v2918_v58 = vpop.f32.mrf.mxu1 }
 0x27c   :  { %v2961_v59 = vpop.f32.mrf.mxu0 }
 0x27d   :  { %v3493_v61 = vmul.f32 %v4374_v25, %v2961_v59  ;;  %v4179_v62 = vpop.f32.mrf.mxu1  ;;  %v4392_v51 = vpop.eup %4391 }
 0x27e   :  { %v4184_v1 = vpop.f32.mrf.mxu0 }
 0x27f   :  { %3544 = vrot.lane.b32.xlu1 %v3493_v61, %s4402_s11  ;;  %v3007_v2 = vpop.f32.mrf.mxu1 }
 0x280   :  { %v2964_v60 = vpop.f32.mrf.mxu0  ;;  %v3494_v63 = vmul.f32 %v4376_v39, %v3007_v2 }
 0x281   :  { %v4190_v3 = vpop.f32.mrf.mxu1  ;;  %v4394_v59 = vpop.eup %4393 }
 0x282   :  { %v4185_v4 = vpop.f32.mrf.mxu0 }
 0x283   :  { %3555 = vrot.lane.b32.xlu1 %v3494_v63, %s4403_s12  ;;  %v3010_v7 = vpop.f32.mrf.mxu1 }
 0x284   :  { %v3053_v9 = vpop.f32.mrf.mxu0 }
 0x285   :  { %v3495_v12 = vmul.f32 %v4378_v8, %v3053_v9  ;;  %v4191_v33 = vpop.f32.mrf.mxu1  ;;  %v4396_v2 = vpop.eup %4395 }
 0x286   :  { %v4196_v40 = vpop.f32.mrf.mxu0 }
 0x287   :  { %3566 = vrot.lane.b32.xlu1 %v3495_v12, %s4404_s13  ;;  %v3099_v37 = vpop.f32.mrf.mxu1 }
 0x288   :  { %v3056_v15 = vpop.f32.mrf.mxu0  ;;  %v3496_v16 = vmul.f32 %v4380_v36, %v3099_v37 }
 0x289   :  { %v4202_v17 = vpop.f32.mrf.mxu1 }
 0x28a   :  { %v4197_v18 = vpop.f32.mrf.mxu0 }
 0x28b   :  { %3577 = vrot.lane.b32.xlu1 %v3496_v16, %s4405_s16  ;;  %v3102_v52 = vpop.f32.mrf.mxu1 }
 0x28c   :  { %v3145_v11 = vpop.f32.mrf.mxu0 }
 0x28d   :  { %v3497_v34 = vmul.f32 %v4382_v53, %v3145_v11  ;;  %v4203_v21 = vpop.f32.mrf.mxu1 }
 0x28e   :  { %v4208_v24 = vpop.f32.mrf.mxu0 }
 0x28f   :  { %3588 = vrot.lane.b32.xlu1 %v3497_v34, %s4406_s17  ;;  %v3191_v38 = vpop.f32.mrf.mxu1 }
 0x290   :  { %v3148_v13 = vpop.f32.mrf.mxu0  ;;  %v3498_v27 = vmul.f32 %v4384_v14, %v3191_v38 }
 0x291   :  { %v4214_v28 = vpop.f32.mrf.mxu1 }
 0x292   :  { %v4209_v44 = vpop.f32.mrf.mxu0 }
 0x293   :  { %3599 = vrot.lane.b32.xlu1 %v3498_v27, %s4407_s18  ;;  %v3194_v29 = vpop.f32.mrf.mxu1 }
 0x294   :  { %v3237_v45 = vpop.f32.mrf.mxu0 }
 0x295   :  { %v3499_v49 = vmul.f32 %v4386_v30, %v3237_v45  ;;  %v4215_v50 = vpop.f32.mrf.mxu1 }
 0x296   :  { %v4220_v32 = vpop.f32.mrf.mxu0 }
 0x297   :  { %3610 = vrot.lane.b32.xlu1 %v3499_v49, %s4408_s19  ;;  %v3283_v41 = vpop.f32.mrf.mxu1 }
 0x298   :  { %v3240_v0 = vpop.f32.mrf.mxu0  ;;  %v3500_v22 = vmul.f32 %v4388_v5, %v3283_v41 }
 0x299   :  { %v4226_v23 = vpop.f32.mrf.mxu1 }
 0x29a   :  { %v4221_v54 = vpop.f32.mrf.mxu0 }
 0x29b   :  { %3621 = vrot.lane.b32.xlu1 %v3500_v22, %s4409_s20  ;;  %v3286_v55 = vpop.f32.mrf.mxu1 }
 0x29c   :  { %v3329_v43 = vpop.f32.mrf.mxu0 }
 0x29d   :  { %v3501_v46 = vmul.f32 %v4390_v42, %v3329_v43  ;;  %v4227_v47 = vpop.f32.mrf.mxu1 }
 0x29e   :  { %v4232_v26 = vpop.f32.mrf.mxu0 }
 0x29f   :  { %3632 = vrot.lane.b32.xlu1 %v3501_v46, %s4410_s21  ;;  %v3375_v56 = vpop.f32.mrf.mxu1 }
 0x2a0   :  { %v3332_v57 = vpop.f32.mrf.mxu0  ;;  %v3502_v31 = vmul.f32 %v4392_v51, %v3375_v56 }
 0x2a1   :  { %v4238_v19 = vpop.f32.mrf.mxu1 }
 0x2a2   :  { %v4233_v58 = vpop.f32.mrf.mxu0 }
 0x2a3   :  { %3643 = vrot.lane.b32.xlu1 %v3502_v31, %s4411_s22  ;;  %v3378_v25 = vpop.f32.mrf.mxu1 }
 0x2a4   :  { %v3421_v61 = vpop.f32.mrf.mxu0  ;;  %v3510_v62 = vpop.permute.xlu0 %3509 }
 0x2a5   :  { %v3503_v1 = vmul.f32 %v4394_v59, %v3421_v61  ;;  %3516 = vst.msk [vmem:[%s5432_s3] sm:$0xff] %vm3515_vm3, %v3510_v62  ;;  %v4239_v39 = vpop.f32.mrf.mxu1 }
 0x2a6   :  { %v4244_v48 = vpop.f32.mrf.mxu0 }
 0x2a7   :  { %3654 = vrot.lane.b32.xlu1 %v3503_v1, %s4412_s23  ;;  %v3467_v60 = vpop.f32.mrf.mxu1 }
 0x2a8   :  { %v3424_v63 = vpop.f32.mrf.mxu0  ;;  %v3504_v3 = vmul.f32 %v4396_v2, %v3467_v60  ;;  %v3521_v4 = vpop.permute.xlu1 %3520 }
 0x2a9   :  { %3527 = vst.msk [vmem:[%s5432_s3] sm:$0xff] %vm3526_vm4, %v3521_v4  ;;  %v4250_v7 = vpop.f32.mrf.mxu1 }
 0x2aa   :  { %v4245_v8 = vpop.f32.mrf.mxu0 }
 0x2ab   :  { %3665 = vrot.lane.b32.xlu1 %v3504_v3, %s4413_s24  ;;  %v3470_v9 = vpop.f32.mrf.mxu1 }
 0x2ac   :  { %v3532_v20 = vpop.permute.xlu0 %3531 }
 0x2ad   :  { %3538 = vst.msk [vmem:[%s5432_s3] sm:$0xff] %vm3537_vm5, %v3532_v20  ;;  %v4251_v12 = vpop.f32.mrf.mxu1 }
 0x2b1   :  { %v3543_v33 = vpop.permute.xlu0 %3542 }
 0x2b2   :  { %3549 = vst.msk [vmem:[%s5432_s3] sm:$0xff] %vm3548_vm6, %v3543_v33 }
 0x2b5   :  { %v3554_v40 = vpop.permute.xlu0 %3553 }
 0x2b6   :  { %3560 = vst.msk [vmem:[%s5432_s3] sm:$0xff] %vm3559_vm7, %v3554_v40 }
 0x2b9   :  { %v3565_v36 = vpop.permute.xlu0 %3564 }
 0x2ba   :  { %3571 = vst.msk [vmem:[%s5432_s3] sm:$0xff] %vm3570_vm8, %v3565_v36 }
 0x2bd   :  { %v3576_v37 = vpop.permute.xlu0 %3575 }
 0x2be   :  { %3582 = vst.msk [vmem:[%s5432_s3] sm:$0xff] %vm3581_vm9, %v3576_v37 }
 0x2c1   :  { %v3587_v15 = vpop.permute.xlu0 %3586 }
 0x2c2   :  { %3593 = vst.msk [vmem:[%s5432_s3] sm:$0xff] %vm3592_vm10, %v3587_v15 }
 0x2c5   :  { %v3598_v16 = vpop.permute.xlu0 %3597 }
 0x2c6   :  { %3604 = vst.msk [vmem:[%s5432_s3] sm:$0xff] %vm3603_vm11, %v3598_v16 }
 0x2c9   :  { %v3609_v17 = vpop.permute.xlu0 %3608 }
 0x2ca   :  { %3615 = vst.msk [vmem:[%s5432_s3] sm:$0xff] %vm3614_vm12, %v3609_v17 }
 0x2cd   :  { %v3620_v18 = vpop.permute.xlu0 %3619 }
 0x2ce   :  { %3626 = vst.msk [vmem:[%s5432_s3] sm:$0xff] %vm3625_vm13, %v3620_v18 }
 0x2d1   :  { %v3631_v10 = vpop.permute.xlu0 %3630 }
 0x2d2   :  { %3637 = vst.msk [vmem:[%s5432_s3] sm:$0xff] %vm3636_vm14, %v3631_v10 }
 0x2d5   :  { %v3642_v52 = vpop.permute.xlu0 %3641 }
 0x2d6   :  { %3648 = vst.msk [vmem:[%s5432_s3] sm:$0xff] %vm3647_vm15, %v3642_v52 }
 0x2d9   :  { %v3653_v53 = vpop.permute.xlu0 %3652 }
 0x2da   :  { %3659 = vst.msk [vmem:[%s5432_s3] sm:$0xff] %vm3658_vm0, %v3653_v53 }
 0x2dd   :  { %v3664_v11 = vpop.permute.xlu0 %3663 }
 0x2de   :  { %3670 = vst.msk [vmem:[%s5432_s3] sm:$0xff] %vm3669_vm1, %v3664_v11 }
 0x2e4   :  { %v3512_v34 = vpop.permute.xlu1 %3511 }
 0x2e5   :  { %3517 = vst.msk [vmem:[%s5432_s3 + $0x8] sm:$0xff] %vm3515_vm3, %v3512_v34 }
 0x2e9   :  { %v3523_v21 = vpop.permute.xlu1 %3522 }
 0x2ea   :  { %3528 = vst.msk [vmem:[%s5432_s3 + $0x8] sm:$0xff] %vm3526_vm4, %v3523_v21 }
 0x2ed   :  { %v3534_v24 = vpop.permute.xlu1 %3533 }
 0x2ee   :  { %3539 = vst.msk [vmem:[%s5432_s3 + $0x8] sm:$0xff] %vm3537_vm5, %v3534_v24 }
 0x2f1   :  { %v3545_v14 = vpop.permute.xlu1 %3544 }
 0x2f2   :  { %3550 = vst.msk [vmem:[%s5432_s3 + $0x8] sm:$0xff] %vm3548_vm6, %v3545_v14 }
 0x2f5   :  { %v3556_v38 = vpop.permute.xlu1 %3555 }
 0x2f6   :  { %3561 = vst.msk [vmem:[%s5432_s3 + $0x8] sm:$0xff] %vm3559_vm7, %v3556_v38 }
 0x2f9   :  { %v3567_v13 = vpop.permute.xlu1 %3566 }
 0x2fa   :  { %3572 = vst.msk [vmem:[%s5432_s3 + $0x8] sm:$0xff] %vm3570_vm8, %v3567_v13 }
 0x2fd   :  { %v3578_v27 = vpop.permute.xlu1 %3577 }
 0x2fe   :  { %3583 = vst.msk [vmem:[%s5432_s3 + $0x8] sm:$0xff] %vm3581_vm9, %v3578_v27 }
 0x301   :  { %v3589_v35 = vpop.permute.xlu1 %3588 }
 0x302   :  { %3594 = vst.msk [vmem:[%s5432_s3 + $0x8] sm:$0xff] %vm3592_vm10, %v3589_v35 }
 0x305   :  { %v3600_v28 = vpop.permute.xlu1 %3599 }
 0x306   :  { %3605 = vst.msk [vmem:[%s5432_s3 + $0x8] sm:$0xff] %vm3603_vm11, %v3600_v28 }
 0x309   :  { %v3611_v44 = vpop.permute.xlu1 %3610 }
 0x30a   :  { %3616 = vst.msk [vmem:[%s5432_s3 + $0x8] sm:$0xff] %vm3614_vm12, %v3611_v44 }
 0x30d   :  { %v3622_v29 = vpop.permute.xlu1 %3621 }
 0x30e   :  { %3627 = vst.msk [vmem:[%s5432_s3 + $0x8] sm:$0xff] %vm3625_vm13, %v3622_v29 }
 0x311   :  { %v3633_v30 = vpop.permute.xlu1 %3632 }
 0x312   :  { %3638 = vst.msk [vmem:[%s5432_s3 + $0x8] sm:$0xff] %vm3636_vm14, %v3633_v30 }
 0x315   :  { %v3644_v45 = vpop.permute.xlu1 %3643 }
 0x316   :  { %3649 = vst.msk [vmem:[%s5432_s3 + $0x8] sm:$0xff] %vm3647_vm15, %v3644_v45 }
 0x319   :  { %v3655_v49 = vpop.permute.xlu1 %3654 }
 0x31a   :  { %3660 = vst.msk [vmem:[%s5432_s3 + $0x8] sm:$0xff] %vm3658_vm0, %v3655_v49 }
 0x31d   :  { %v3666_v50 = vpop.permute.xlu1 %3665 }
 0x31e   :  { %3671 = vst.msk [vmem:[%s5432_s3 + $0x8] sm:$0xff] %vm3669_vm1, %v3666_v50 }

</bundles_post_ra>
